<compile_context>
chip_gen: v7x
topology: tpu7x:2x2x1
jax: 0.10.0
libtpu: 0.0.40
codegen_flags: <defaults>
</compile_context>

<pallas_src>
import functools

import jax
import jax.numpy as jnp
import numpy as np
from jax.experimental import pallas as pl
from jax.experimental.pallas import tpu as pltpu

BN_EPS = 1e-5
_HIGHEST = jax.lax.Precision.HIGHEST

# Parameter-slab layout: rows are 8-aligned so in-kernel slices never straddle
# an unaligned sublane boundary.  Cols 0:64 = weight matrices, col 64 = BN
# gamma (or conv1x1_2 bias), col 65 = BN beta.
_ROW_W1, _ROW_W2, _ROW_W3, _ROW_W4, _ROW_W5, _ROW_W6 = 0, 8, 16, 32, 48, 56
_COL_GAMMA, _COL_BETA = 64, 65
_SLAB_SHAPE = (64, 128)


def _dot(a, b):
    return jnp.dot(a, b, preferred_element_type=jnp.float32, precision=_HIGHEST)


# ----------------------------------------------------------------------------
# Fused kernel: whole forward pass, activations resident in VMEM / vregs.
# ----------------------------------------------------------------------------
def fused_cnn_kernel(x_ref, p_ref, o_ref, *, grid_hw, n_batch, c_in):
    gh, gw = grid_hw

    def bn_relu(y, r0):
        # Train-mode BatchNorm (batch statistics) + ReLU.  y is (C, M):
        # channels on sublanes, pixels*batch on lanes -> lane-dense reductions
        # and a (C,1) affine broadcast.  Two-pass variance (matches reference).
        c = y.shape[0]
        g = p_ref[r0:r0 + c, _COL_GAMMA:_COL_GAMMA + 1]     # (C, 1)
        be = p_ref[r0:r0 + c, _COL_BETA:_COL_BETA + 1]      # (C, 1)
        inv_m = 1.0 / y.shape[1]
        mean = jnp.sum(y, axis=1, keepdims=True) * inv_m
        d = y - mean
        var = jnp.sum(d * d, axis=1, keepdims=True) * inv_m
        return jnp.maximum(d * jax.lax.rsqrt(var + BN_EPS) * g + be, 0.0)

    # ---- conv1 + bn1 + relu: the four 2x2 taps were folded into the
    # contraction dim by the host permutation -> ONE matmul, K = 4*c_in.
    y = bn_relu(_dot(p_ref[_ROW_W1:_ROW_W1 + 4, 0:4 * c_in], x_ref[...]),
                _ROW_W1)                                    # (4, n*h*w/4)

    # ---- conv2..conv4 (+ bn + relu): each 2x2/s2 conv is four matmuls over
    # four CONTIGUOUS lane blocks (hierarchical tap-major pixel order).
    for r0, cout, cin in ((_ROW_W2, 8, 4), (_ROW_W3, 16, 8), (_ROW_W4, 16, 16)):
        m = y.shape[1] // 4
        w = p_ref[r0:r0 + cout, 0:4 * cin]                  # cols = (tap, cin)
        acc = _dot(w[:, 0:cin], y[:, 0:m])
        for t in range(1, 4):
            acc = acc + _dot(w[:, t * cin:(t + 1) * cin], y[:, t * m:(t + 1) * m])
        y = bn_relu(acc, r0)

    # ---- conv1x1_1 + bn + relu
    y = bn_relu(_dot(p_ref[_ROW_W5:_ROW_W5 + 4, 0:16], y), _ROW_W5)   # (4, Q)

    # ---- conv1x1_2 (bias only; no BN / ReLU)
    z = (_dot(p_ref[_ROW_W6:_ROW_W6 + 1, 0:4], y)
         + p_ref[_ROW_W6:_ROW_W6 + 1, _COL_GAMMA:_COL_GAMMA + 1])     # (1, Q)

    # ---- expand(): lane q = (I*gw + J)*n_batch + n holds zipped[n, 0, I, J];
    # each value fills out[n, 16I:16I+16, 16J:16J+16].  Output is only 8 KiB;
    # static lane extract + splat + block store, no in-kernel transposes.
    for nn in range(n_batch):
        for ii in range(gh):
            for jj in range(gw):
                q = (ii * gw + jj) * n_batch + nn
                o_ref[nn, 16 * ii:16 * ii + 16, 16 * jj:16 * jj + 16] = (
                    jnp.broadcast_to(z[0:1, q:q + 1], (16, 16)))


# ----------------------------------------------------------------------------
# Host-side layout prep (one small permutation of the raw input, no padding,
# and one packed parameter slab = one prologue DMA each).
# ----------------------------------------------------------------------------
def _prep_input(x_nchw):
    """(N,C,H,W) -> (4*C, N*H*W/4) channel-major, hierarchical tap-major pixels.

    Sublanes = (i&1, j&1, c)  -> conv1's four taps are folded into K.
    Lanes    = (i>>1&1, j>>1&1, i>>2&1, j>>2&1, i>>3&1, j>>3&1, i>>4, j>>4, n)
    so each later 2x2/s2 layer's four taps are contiguous lane blocks (self-
    similar), and after conv4 the lane index is (I*gw + J)*N + n, which is
    exactly the order expand() consumes.
    """
    n, c, h, w = x_nchw.shape
    gh, gw = h // 16, w // 16
    x = x_nchw.reshape(n, c, gh, 2, 2, 2, 2, gw, 2, 2, 2, 2)
    # axes: 0 n | 1 c | 2 I, 3 i3, 4 i2, 5 i1, 6 i0 | 7 J, 8 j3, 9 j2, 10 j1, 11 j0
    x = jnp.transpose(x, (6, 11, 1, 5, 10, 4, 9, 3, 8, 2, 7, 0))
    return x.reshape(4 * c, (n * h * w) // 4)


def _build_param_slab(p):
    """Pack all weights / BN affines / conv1x1_2 bias into ONE (64,128) slab.

    Conv biases of conv1..conv1x1_1 are dropped: they cancel exactly under
    train-mode BatchNorm ((y+b) - mean(y+b) == y - mean(y)).  NOTE: only valid
    for batch-statistics BN; an eval-mode (running-stats) port must re-add them.
    """
    f32 = jnp.float32

    def wmat2x2(wt):   # (cout, cin, 2, 2) -> (cout, 4*cin), cols = (tap, cin)
        co, ci = wt.shape[0], wt.shape[1]
        return jnp.transpose(wt, (0, 2, 3, 1)).reshape(co, 4 * ci).astype(f32)

    slab = jnp.zeros(_SLAB_SHAPE, f32)
    for name, r0 in (("conv1", _ROW_W1), ("conv2", _ROW_W2),
                     ("conv3", _ROW_W3), ("conv4", _ROW_W4)):
        w, _b, g, bt = p[name]
        wm = wmat2x2(w)
        co = wm.shape[0]
        slab = slab.at[r0:r0 + co, 0:wm.shape[1]].set(wm)
        slab = slab.at[r0:r0 + co, _COL_GAMMA].set(g.astype(f32))
        slab = slab.at[r0:r0 + co, _COL_BETA].set(bt.astype(f32))
    w5, _b5, g5, bt5 = p["conv1x1_1"]
    slab = slab.at[_ROW_W5:_ROW_W5 + 4, 0:16].set(w5.reshape(4, 16).astype(f32))
    slab = slab.at[_ROW_W5:_ROW_W5 + 4, _COL_GAMMA].set(g5.astype(f32))
    slab = slab.at[_ROW_W5:_ROW_W5 + 4, _COL_BETA].set(bt5.astype(f32))
    w6, b6 = p["conv1x1_2"]
    slab = slab.at[_ROW_W6:_ROW_W6 + 1, 0:4].set(w6.reshape(1, 4).astype(f32))
    slab = slab.at[_ROW_W6, _COL_GAMMA].set(b6.reshape(()).astype(f32))
    return slab


def forward(x_nchw, p):
    n, c_in, h, w = x_nchw.shape
    assert h == w and h % 16 == 0, "expand() needs square input, width % 16 == 0"
    gh, gw = h // 16, w // 16

    x2d = _prep_input(x_nchw.astype(jnp.float32))      # (4*c_in, n*h*w/4)
    slab = _build_param_slab(p)                        # (64, 128) = 32 KiB

    # Gridless all-in-VMEM design; guard its scaling limit (v5e scoped-VMEM
    # default 16 MiB, v7x 64 MiB physical).
    # TODO(synk): gridded two-pass-BN variant (per-tile sum / sum-of-squares
    # accumulators + finalize) for large n*h*w.
    assert x2d.size * 4 < 8 * 1024 * 1024, "input too large for gridless VMEM design"

    kernel = functools.partial(fused_cnn_kernel, grid_hw=(gh, gw),
                               n_batch=n, c_in=c_in)
    out = pl.pallas_call(
        kernel,
        out_shape=jax.ShapeDtypeStruct((n, h, w), jnp.float32),
        in_specs=[pl.BlockSpec(memory_space=pltpu.MemorySpace.VMEM)] * 2,
        out_specs=pl.BlockSpec(memory_space=pltpu.MemorySpace.VMEM),
    )(x2d, slab)
    return out[:, None, :, :]                          # (N, 1, W, W), NCHW


# ----------------------------------------------------------------------------
# Pure-JAX reference (for the correctness check)
# ----------------------------------------------------------------------------
def reference_forward(x, p):
    def conv(h, w, b, stride):
        y = jax.lax.conv_general_dilated(
            h, w, window_strides=(stride, stride), padding="VALID",
            dimension_numbers=("NCHW", "OIHW", "NCHW"), precision=_HIGHEST)
        return y + b[None, :, None, None]

    def bn(h, g, bt):
        m = jnp.mean(h, axis=(0, 2, 3), keepdims=True)
        v = jnp.mean((h - m) ** 2, axis=(0, 2, 3), keepdims=True)
        return ((h - m) * jax.lax.rsqrt(v + BN_EPS)
                * g[None, :, None, None] + bt[None, :, None, None])

    h = x
    for name in ("conv1", "conv2", "conv3", "conv4"):
        w, b, g, bt = p[name]
        h = jnp.maximum(bn(conv(h, w, b, 2), g, bt), 0.0)
    w, b, g, bt = p["conv1x1_1"]
    h = jnp.maximum(bn(conv(h, w, b, 1), g, bt), 0.0)
    w, b = p["conv1x1_2"]
    h = conv(h, w, b, 1)
    return jnp.repeat(jnp.repeat(h, 16, axis=2), 16, axis=3)


# ----------------------------------------------------------------------------
# Parameter init (deterministic, synthetic)
# ----------------------------------------------------------------------------
def init_params(key):
    def conv_init(k, cout, cin, ksz):
        k1, k2 = jax.random.split(k)
        w = jax.random.normal(k1, (cout, cin, ksz, ksz), jnp.float32) * 0.2
        b = jax.random.normal(k2, (cout,), jnp.float32) * 0.1
        return w, b

    def bn_init(k, c):
        k1, k2 = jax.random.split(k)
        g = 1.0 + 0.1 * jax.random.normal(k1, (c,), jnp.float32)
        bt = 0.1 * jax.random.normal(k2, (c,), jnp.float32)
        return g, bt

    shapes = {"conv1": (4, 3, 2), "conv2": (8, 4, 2), "conv3": (16, 8, 2),
              "conv4": (16, 16, 2), "conv1x1_1": (4, 16, 1)}
    params = {}
    keys = jax.random.split(key, len(shapes) * 2 + 1)
    for i, (name, (co, ci, ks)) in enumerate(shapes.items()):
        w, b = conv_init(keys[2 * i], co, ci, ks)
        g, bt = bn_init(keys[2 * i + 1], co)
        params[name] = (w, b, g, bt)
    params["conv1x1_2"] = conv_init(keys[-1], 1, 4, 1)
    return params


if __name__ == "__main__":
    key = jax.random.PRNGKey(0)
    pkey, xkey = jax.random.split(key)
    params = init_params(pkey)

    # Input width must be a multiple of 16 (four stride-2 convs + expand(16)).
    x = jax.random.normal(xkey, (2, 3, 32, 32), jnp.float32)   # NCHW

    out = jax.block_until_ready(jax.jit(forward)(x, params))
    assert out.shape == (2, 1, 32, 32), out.shape

    ref = reference_forward(x, params)
    np.testing.assert_allclose(np.asarray(out), np.asarray(ref),
                               rtol=1e-3, atol=1e-3)
    print("KERNEL_OK")
</pallas_src>

<mosaic_0001>
module attributes {stable_mosaic.version = 11 : i64} {
  func.func @fused_cnn_kernel(%arg0: memref<12x512xf32, #tpu.memory_space<vmem>>, %arg1: memref<64x128xf32, #tpu.memory_space<vmem>>, %arg2: memref<2x32x32xf32, #tpu.memory_space<vmem>>) attributes {dimension_semantics = [], scalar_prefetch = 0 : i64, scratch_operands = 0 : i64, tpu.core_type = #tpu.core_type<tc>} {
    %c0 = arith.constant 0 : index
    %c0_0 = arith.constant 0 : index
    %0 = vector.load %arg1[%c0, %c0_0] : memref<64x128xf32, #tpu.memory_space<vmem>>, vector<4x12xf32>
    %c0_1 = arith.constant 0 : index
    %c0_2 = arith.constant 0 : index
    %1 = vector.load %arg0[%c0_1, %c0_2] : memref<12x512xf32, #tpu.memory_space<vmem>>, vector<12x512xf32>
    %cst = arith.constant dense<0.000000e+00> : vector<4x512xf32>
    %2 = tpu.matmul %0, %1, %cst {dimension_numbers = #tpu.dot_dimension_numbers<[1], [0], [0], [1], [0, 0, 1, 1], [], []>, precision = #tpu.contract_precision<fp32>} : vector<4x12xf32>, vector<12x512xf32>, vector<4x512xf32> -> vector<4x512xf32>
    %c0_3 = arith.constant 0 : index
    %c64 = arith.constant 64 : index
    %3 = vector.load %arg1[%c0_3, %c64] : memref<64x128xf32, #tpu.memory_space<vmem>>, vector<4x1xf32>
    %c0_4 = arith.constant 0 : index
    %c65 = arith.constant 65 : index
    %4 = vector.load %arg1[%c0_4, %c65] : memref<64x128xf32, #tpu.memory_space<vmem>>, vector<4x1xf32>
    %cst_5 = arith.constant dense<0.000000e+00> : vector<4xf32>
    %5 = vector.multi_reduction <add>, %2, %cst_5 [1] : vector<4x512xf32> to vector<4xf32>
    %6 = vector.shape_cast %5 : vector<4xf32> to vector<4x1xf32>
    %cst_6 = arith.constant 0.001953125 : f32
    %7 = vector.broadcast %cst_6 : f32 to vector<4x1xf32>
    %8 = arith.mulf %6, %7 : vector<4x1xf32>
    %9 = vector.broadcast %8 : vector<4x1xf32> to vector<4x512xf32>
    %10 = arith.subf %2, %9 : vector<4x512xf32>
    %11 = arith.mulf %10, %10 : vector<4x512xf32>
    %cst_7 = arith.constant dense<0.000000e+00> : vector<4xf32>
    %12 = vector.multi_reduction <add>, %11, %cst_7 [1] : vector<4x512xf32> to vector<4xf32>
    %13 = vector.shape_cast %12 : vector<4xf32> to vector<4x1xf32>
    %cst_8 = arith.constant 0.001953125 : f32
    %14 = vector.broadcast %cst_8 : f32 to vector<4x1xf32>
    %15 = arith.mulf %13, %14 : vector<4x1xf32>
    %cst_9 = arith.constant 9.99999974E-6 : f32
    %16 = vector.broadcast %cst_9 : f32 to vector<4x1xf32>
    %17 = arith.addf %15, %16 : vector<4x1xf32>
    %18 = math.rsqrt %17 : vector<4x1xf32>
    %19 = vector.broadcast %18 : vector<4x1xf32> to vector<4x512xf32>
    %20 = arith.mulf %10, %19 : vector<4x512xf32>
    %21 = vector.broadcast %3 : vector<4x1xf32> to vector<4x512xf32>
    %22 = arith.mulf %20, %21 : vector<4x512xf32>
    %23 = vector.broadcast %4 : vector<4x1xf32> to vector<4x512xf32>
    %24 = arith.addf %22, %23 : vector<4x512xf32>
    %cst_10 = arith.constant 0.000000e+00 : f32
    %25 = vector.broadcast %cst_10 : f32 to vector<4x512xf32>
    %26 = arith.maximumf %24, %25 : vector<4x512xf32>
    %c8 = arith.constant 8 : index
    %c0_11 = arith.constant 0 : index
    %27 = vector.load %arg1[%c8, %c0_11] : memref<64x128xf32, #tpu.memory_space<vmem>>, vector<8x16xf32>
    %28 = vector.extract_strided_slice %27 {offsets = [0, 0], sizes = [8, 4], strides = [1, 1]} : vector<8x16xf32> to vector<8x4xf32>
    %29 = vector.extract_strided_slice %26 {offsets = [0, 0], sizes = [4, 128], strides = [1, 1]} : vector<4x512xf32> to vector<4x128xf32>
    %cst_12 = arith.constant dense<0.000000e+00> : vector<8x128xf32>
    %30 = tpu.matmul %28, %29, %cst_12 {dimension_numbers = #tpu.dot_dimension_numbers<[1], [0], [0], [1], [0, 0, 1, 1], [], []>, precision = #tpu.contract_precision<fp32>} : vector<8x4xf32>, vector<4x128xf32>, vector<8x128xf32> -> vector<8x128xf32>
    %31 = vector.extract_strided_slice %27 {offsets = [0, 4], sizes = [8, 4], strides = [1, 1]} : vector<8x16xf32> to vector<8x4xf32>
    %32 = vector.extract_strided_slice %26 {offsets = [0, 128], sizes = [4, 128], strides = [1, 1]} : vector<4x512xf32> to vector<4x128xf32>
    %cst_13 = arith.constant dense<0.000000e+00> : vector<8x128xf32>
    %33 = tpu.matmul %31, %32, %cst_13 {dimension_numbers = #tpu.dot_dimension_numbers<[1], [0], [0], [1], [0, 0, 1, 1], [], []>, precision = #tpu.contract_precision<fp32>} : vector<8x4xf32>, vector<4x128xf32>, vector<8x128xf32> -> vector<8x128xf32>
    %34 = arith.addf %30, %33 : vector<8x128xf32>
    %35 = vector.extract_strided_slice %27 {offsets = [0, 8], sizes = [8, 4], strides = [1, 1]} : vector<8x16xf32> to vector<8x4xf32>
    %36 = vector.extract_strided_slice %26 {offsets = [0, 256], sizes = [4, 128], strides = [1, 1]} : vector<4x512xf32> to vector<4x128xf32>
    %cst_14 = arith.constant dense<0.000000e+00> : vector<8x128xf32>
    %37 = tpu.matmul %35, %36, %cst_14 {dimension_numbers = #tpu.dot_dimension_numbers<[1], [0], [0], [1], [0, 0, 1, 1], [], []>, precision = #tpu.contract_precision<fp32>} : vector<8x4xf32>, vector<4x128xf32>, vector<8x128xf32> -> vector<8x128xf32>
    %38 = arith.addf %34, %37 : vector<8x128xf32>
    %39 = vector.extract_strided_slice %27 {offsets = [0, 12], sizes = [8, 4], strides = [1, 1]} : vector<8x16xf32> to vector<8x4xf32>
    %40 = vector.extract_strided_slice %26 {offsets = [0, 384], sizes = [4, 128], strides = [1, 1]} : vector<4x512xf32> to vector<4x128xf32>
    %cst_15 = arith.constant dense<0.000000e+00> : vector<8x128xf32>
    %41 = tpu.matmul %39, %40, %cst_15 {dimension_numbers = #tpu.dot_dimension_numbers<[1], [0], [0], [1], [0, 0, 1, 1], [], []>, precision = #tpu.contract_precision<fp32>} : vector<8x4xf32>, vector<4x128xf32>, vector<8x128xf32> -> vector<8x128xf32>
    %42 = arith.addf %38, %41 : vector<8x128xf32>
    %c8_16 = arith.constant 8 : index
    %c64_17 = arith.constant 64 : index
    %43 = vector.load %arg1[%c8_16, %c64_17] : memref<64x128xf32, #tpu.memory_space<vmem>>, vector<8x1xf32>
    %c8_18 = arith.constant 8 : index
    %c65_19 = arith.constant 65 : index
    %44 = vector.load %arg1[%c8_18, %c65_19] : memref<64x128xf32, #tpu.memory_space<vmem>>, vector<8x1xf32>
    %cst_20 = arith.constant dense<0.000000e+00> : vector<8xf32>
    %45 = vector.multi_reduction <add>, %42, %cst_20 [1] : vector<8x128xf32> to vector<8xf32>
    %46 = vector.shape_cast %45 : vector<8xf32> to vector<8x1xf32>
    %cst_21 = arith.constant 7.812500e-03 : f32
    %47 = vector.broadcast %cst_21 : f32 to vector<8x1xf32>
    %48 = arith.mulf %46, %47 : vector<8x1xf32>
    %49 = vector.broadcast %48 : vector<8x1xf32> to vector<8x128xf32>
    %50 = arith.subf %42, %49 : vector<8x128xf32>
    %51 = arith.mulf %50, %50 : vector<8x128xf32>
    %cst_22 = arith.constant dense<0.000000e+00> : vector<8xf32>
    %52 = vector.multi_reduction <add>, %51, %cst_22 [1] : vector<8x128xf32> to vector<8xf32>
    %53 = vector.shape_cast %52 : vector<8xf32> to vector<8x1xf32>
    %cst_23 = arith.constant 7.812500e-03 : f32
    %54 = vector.broadcast %cst_23 : f32 to vector<8x1xf32>
    %55 = arith.mulf %53, %54 : vector<8x1xf32>
    %cst_24 = arith.constant 9.99999974E-6 : f32
    %56 = vector.broadcast %cst_24 : f32 to vector<8x1xf32>
    %57 = arith.addf %55, %56 : vector<8x1xf32>
    %58 = math.rsqrt %57 : vector<8x1xf32>
    %59 = vector.broadcast %58 : vector<8x1xf32> to vector<8x128xf32>
    %60 = arith.mulf %50, %59 : vector<8x128xf32>
    %61 = vector.broadcast %43 : vector<8x1xf32> to vector<8x128xf32>
    %62 = arith.mulf %60, %61 : vector<8x128xf32>
    %63 = vector.broadcast %44 : vector<8x1xf32> to vector<8x128xf32>
    %64 = arith.addf %62, %63 : vector<8x128xf32>
    %cst_25 = arith.constant 0.000000e+00 : f32
    %65 = vector.broadcast %cst_25 : f32 to vector<8x128xf32>
    %66 = arith.maximumf %64, %65 : vector<8x128xf32>
    %c16 = arith.constant 16 : index
    %c0_26 = arith.constant 0 : index
    %67 = vector.load %arg1[%c16, %c0_26] : memref<64x128xf32, #tpu.memory_space<vmem>>, vector<16x32xf32>
    %68 = vector.extract_strided_slice %67 {offsets = [0, 0], sizes = [16, 8], strides = [1, 1]} : vector<16x32xf32> to vector<16x8xf32>
    %69 = vector.extract_strided_slice %66 {offsets = [0, 0], sizes = [8, 32], strides = [1, 1]} : vector<8x128xf32> to vector<8x32xf32>
    %cst_27 = arith.constant dense<0.000000e+00> : vector<16x32xf32>
    %70 = tpu.matmul %68, %69, %cst_27 {dimension_numbers = #tpu.dot_dimension_numbers<[1], [0], [0], [1], [0, 0, 1, 1], [], []>, precision = #tpu.contract_precision<fp32>} : vector<16x8xf32>, vector<8x32xf32>, vector<16x32xf32> -> vector<16x32xf32>
    %71 = vector.extract_strided_slice %67 {offsets = [0, 8], sizes = [16, 8], strides = [1, 1]} : vector<16x32xf32> to vector<16x8xf32>
    %72 = vector.extract_strided_slice %66 {offsets = [0, 32], sizes = [8, 32], strides = [1, 1]} : vector<8x128xf32> to vector<8x32xf32>
    %cst_28 = arith.constant dense<0.000000e+00> : vector<16x32xf32>
    %73 = tpu.matmul %71, %72, %cst_28 {dimension_numbers = #tpu.dot_dimension_numbers<[1], [0], [0], [1], [0, 0, 1, 1], [], []>, precision = #tpu.contract_precision<fp32>} : vector<16x8xf32>, vector<8x32xf32>, vector<16x32xf32> -> vector<16x32xf32>
    %74 = arith.addf %70, %73 : vector<16x32xf32>
    %75 = vector.extract_strided_slice %67 {offsets = [0, 16], sizes = [16, 8], strides = [1, 1]} : vector<16x32xf32> to vector<16x8xf32>
    %76 = vector.extract_strided_slice %66 {offsets = [0, 64], sizes = [8, 32], strides = [1, 1]} : vector<8x128xf32> to vector<8x32xf32>
    %cst_29 = arith.constant dense<0.000000e+00> : vector<16x32xf32>
    %77 = tpu.matmul %75, %76, %cst_29 {dimension_numbers = #tpu.dot_dimension_numbers<[1], [0], [0], [1], [0, 0, 1, 1], [], []>, precision = #tpu.contract_precision<fp32>} : vector<16x8xf32>, vector<8x32xf32>, vector<16x32xf32> -> vector<16x32xf32>
    %78 = arith.addf %74, %77 : vector<16x32xf32>
    %79 = vector.extract_strided_slice %67 {offsets = [0, 24], sizes = [16, 8], strides = [1, 1]} : vector<16x32xf32> to vector<16x8xf32>
    %80 = vector.extract_strided_slice %66 {offsets = [0, 96], sizes = [8, 32], strides = [1, 1]} : vector<8x128xf32> to vector<8x32xf32>
    %cst_30 = arith.constant dense<0.000000e+00> : vector<16x32xf32>
    %81 = tpu.matmul %79, %80, %cst_30 {dimension_numbers = #tpu.dot_dimension_numbers<[1], [0], [0], [1], [0, 0, 1, 1], [], []>, precision = #tpu.contract_precision<fp32>} : vector<16x8xf32>, vector<8x32xf32>, vector<16x32xf32> -> vector<16x32xf32>
    %82 = arith.addf %78, %81 : vector<16x32xf32>
    %c16_31 = arith.constant 16 : index
    %c64_32 = arith.constant 64 : index
    %83 = vector.load %arg1[%c16_31, %c64_32] : memref<64x128xf32, #tpu.memory_space<vmem>>, vector<16x1xf32>
    %c16_33 = arith.constant 16 : index
    %c65_34 = arith.constant 65 : index
    %84 = vector.load %arg1[%c16_33, %c65_34] : memref<64x128xf32, #tpu.memory_space<vmem>>, vector<16x1xf32>
    %cst_35 = arith.constant dense<0.000000e+00> : vector<16xf32>
    %85 = vector.multi_reduction <add>, %82, %cst_35 [1] : vector<16x32xf32> to vector<16xf32>
    %86 = vector.shape_cast %85 : vector<16xf32> to vector<16x1xf32>
    %cst_36 = arith.constant 3.125000e-02 : f32
    %87 = vector.broadcast %cst_36 : f32 to vector<16x1xf32>
    %88 = arith.mulf %86, %87 : vector<16x1xf32>
    %89 = vector.broadcast %88 : vector<16x1xf32> to vector<16x32xf32>
    %90 = arith.subf %82, %89 : vector<16x32xf32>
    %91 = arith.mulf %90, %90 : vector<16x32xf32>
    %cst_37 = arith.constant dense<0.000000e+00> : vector<16xf32>
    %92 = vector.multi_reduction <add>, %91, %cst_37 [1] : vector<16x32xf32> to vector<16xf32>
    %93 = vector.shape_cast %92 : vector<16xf32> to vector<16x1xf32>
    %cst_38 = arith.constant 3.125000e-02 : f32
    %94 = vector.broadcast %cst_38 : f32 to vector<16x1xf32>
    %95 = arith.mulf %93, %94 : vector<16x1xf32>
    %cst_39 = arith.constant 9.99999974E-6 : f32
    %96 = vector.broadcast %cst_39 : f32 to vector<16x1xf32>
    %97 = arith.addf %95, %96 : vector<16x1xf32>
    %98 = math.rsqrt %97 : vector<16x1xf32>
    %99 = vector.broadcast %98 : vector<16x1xf32> to vector<16x32xf32>
    %100 = arith.mulf %90, %99 : vector<16x32xf32>
    %101 = vector.broadcast %83 : vector<16x1xf32> to vector<16x32xf32>
    %102 = arith.mulf %100, %101 : vector<16x32xf32>
    %103 = vector.broadcast %84 : vector<16x1xf32> to vector<16x32xf32>
    %104 = arith.addf %102, %103 : vector<16x32xf32>
    %cst_40 = arith.constant 0.000000e+00 : f32
    %105 = vector.broadcast %cst_40 : f32 to vector<16x32xf32>
    %106 = arith.maximumf %104, %105 : vector<16x32xf32>
    %c32 = arith.constant 32 : index
    %c0_41 = arith.constant 0 : index
    %107 = vector.load %arg1[%c32, %c0_41] : memref<64x128xf32, #tpu.memory_space<vmem>>, vector<16x64xf32>
    %108 = vector.extract_strided_slice %107 {offsets = [0, 0], sizes = [16, 16], strides = [1, 1]} : vector<16x64xf32> to vector<16x16xf32>
    %109 = vector.extract_strided_slice %106 {offsets = [0, 0], sizes = [16, 8], strides = [1, 1]} : vector<16x32xf32> to vector<16x8xf32>
    %cst_42 = arith.constant dense<0.000000e+00> : vector<16x8xf32>
    %110 = tpu.matmul %108, %109, %cst_42 {dimension_numbers = #tpu.dot_dimension_numbers<[1], [0], [0], [1], [0, 0, 1, 1], [], []>, precision = #tpu.contract_precision<fp32>} : vector<16x16xf32>, vector<16x8xf32>, vector<16x8xf32> -> vector<16x8xf32>
    %111 = vector.extract_strided_slice %107 {offsets = [0, 16], sizes = [16, 16], strides = [1, 1]} : vector<16x64xf32> to vector<16x16xf32>
    %112 = vector.extract_strided_slice %106 {offsets = [0, 8], sizes = [16, 8], strides = [1, 1]} : vector<16x32xf32> to vector<16x8xf32>
    %cst_43 = arith.constant dense<0.000000e+00> : vector<16x8xf32>
    %113 = tpu.matmul %111, %112, %cst_43 {dimension_numbers = #tpu.dot_dimension_numbers<[1], [0], [0], [1], [0, 0, 1, 1], [], []>, precision = #tpu.contract_precision<fp32>} : vector<16x16xf32>, vector<16x8xf32>, vector<16x8xf32> -> vector<16x8xf32>
    %114 = arith.addf %110, %113 : vector<16x8xf32>
    %115 = vector.extract_strided_slice %107 {offsets = [0, 32], sizes = [16, 16], strides = [1, 1]} : vector<16x64xf32> to vector<16x16xf32>
    %116 = vector.extract_strided_slice %106 {offsets = [0, 16], sizes = [16, 8], strides = [1, 1]} : vector<16x32xf32> to vector<16x8xf32>
    %cst_44 = arith.constant dense<0.000000e+00> : vector<16x8xf32>
    %117 = tpu.matmul %115, %116, %cst_44 {dimension_numbers = #tpu.dot_dimension_numbers<[1], [0], [0], [1], [0, 0, 1, 1], [], []>, precision = #tpu.contract_precision<fp32>} : vector<16x16xf32>, vector<16x8xf32>, vector<16x8xf32> -> vector<16x8xf32>
    %118 = arith.addf %114, %117 : vector<16x8xf32>
    %119 = vector.extract_strided_slice %107 {offsets = [0, 48], sizes = [16, 16], strides = [1, 1]} : vector<16x64xf32> to vector<16x16xf32>
    %120 = vector.extract_strided_slice %106 {offsets = [0, 24], sizes = [16, 8], strides = [1, 1]} : vector<16x32xf32> to vector<16x8xf32>
    %cst_45 = arith.constant dense<0.000000e+00> : vector<16x8xf32>
    %121 = tpu.matmul %119, %120, %cst_45 {dimension_numbers = #tpu.dot_dimension_numbers<[1], [0], [0], [1], [0, 0, 1, 1], [], []>, precision = #tpu.contract_precision<fp32>} : vector<16x16xf32>, vector<16x8xf32>, vector<16x8xf32> -> vector<16x8xf32>
    %122 = arith.addf %118, %121 : vector<16x8xf32>
    %c32_46 = arith.constant 32 : index
    %c64_47 = arith.constant 64 : index
    %123 = vector.load %arg1[%c32_46, %c64_47] : memref<64x128xf32, #tpu.memory_space<vmem>>, vector<16x1xf32>
    %c32_48 = arith.constant 32 : index
    %c65_49 = arith.constant 65 : index
    %124 = vector.load %arg1[%c32_48, %c65_49] : memref<64x128xf32, #tpu.memory_space<vmem>>, vector<16x1xf32>
    %cst_50 = arith.constant dense<0.000000e+00> : vector<16xf32>
    %125 = vector.multi_reduction <add>, %122, %cst_50 [1] : vector<16x8xf32> to vector<16xf32>
    %126 = vector.shape_cast %125 : vector<16xf32> to vector<16x1xf32>
    %cst_51 = arith.constant 1.250000e-01 : f32
    %127 = vector.broadcast %cst_51 : f32 to vector<16x1xf32>
    %128 = arith.mulf %126, %127 : vector<16x1xf32>
    %129 = vector.broadcast %128 : vector<16x1xf32> to vector<16x8xf32>
    %130 = arith.subf %122, %129 : vector<16x8xf32>
    %131 = arith.mulf %130, %130 : vector<16x8xf32>
    %cst_52 = arith.constant dense<0.000000e+00> : vector<16xf32>
    %132 = vector.multi_reduction <add>, %131, %cst_52 [1] : vector<16x8xf32> to vector<16xf32>
    %133 = vector.shape_cast %132 : vector<16xf32> to vector<16x1xf32>
    %cst_53 = arith.constant 1.250000e-01 : f32
    %134 = vector.broadcast %cst_53 : f32 to vector<16x1xf32>
    %135 = arith.mulf %133, %134 : vector<16x1xf32>
    %cst_54 = arith.constant 9.99999974E-6 : f32
    %136 = vector.broadcast %cst_54 : f32 to vector<16x1xf32>
    %137 = arith.addf %135, %136 : vector<16x1xf32>
    %138 = math.rsqrt %137 : vector<16x1xf32>
    %139 = vector.broadcast %138 : vector<16x1xf32> to vector<16x8xf32>
    %140 = arith.mulf %130, %139 : vector<16x8xf32>
    %141 = vector.broadcast %123 : vector<16x1xf32> to vector<16x8xf32>
    %142 = arith.mulf %140, %141 : vector<16x8xf32>
    %143 = vector.broadcast %124 : vector<16x1xf32> to vector<16x8xf32>
    %144 = arith.addf %142, %143 : vector<16x8xf32>
    %cst_55 = arith.constant 0.000000e+00 : f32
    %145 = vector.broadcast %cst_55 : f32 to vector<16x8xf32>
    %146 = arith.maximumf %144, %145 : vector<16x8xf32>
    %c48 = arith.constant 48 : index
    %c0_56 = arith.constant 0 : index
    %147 = vector.load %arg1[%c48, %c0_56] : memref<64x128xf32, #tpu.memory_space<vmem>>, vector<4x16xf32>
    %cst_57 = arith.constant dense<0.000000e+00> : vector<4x8xf32>
    %148 = tpu.matmul %147, %146, %cst_57 {dimension_numbers = #tpu.dot_dimension_numbers<[1], [0], [0], [1], [0, 0, 1, 1], [], []>, precision = #tpu.contract_precision<fp32>} : vector<4x16xf32>, vector<16x8xf32>, vector<4x8xf32> -> vector<4x8xf32>
    %c48_58 = arith.constant 48 : index
    %c64_59 = arith.constant 64 : index
    %149 = vector.load %arg1[%c48_58, %c64_59] : memref<64x128xf32, #tpu.memory_space<vmem>>, vector<4x1xf32>
    %c48_60 = arith.constant 48 : index
    %c65_61 = arith.constant 65 : index
    %150 = vector.load %arg1[%c48_60, %c65_61] : memref<64x128xf32, #tpu.memory_space<vmem>>, vector<4x1xf32>
    %cst_62 = arith.constant dense<0.000000e+00> : vector<4xf32>
    %151 = vector.multi_reduction <add>, %148, %cst_62 [1] : vector<4x8xf32> to vector<4xf32>
    %152 = vector.shape_cast %151 : vector<4xf32> to vector<4x1xf32>
    %cst_63 = arith.constant 1.250000e-01 : f32
    %153 = vector.broadcast %cst_63 : f32 to vector<4x1xf32>
    %154 = arith.mulf %152, %153 : vector<4x1xf32>
    %155 = vector.broadcast %154 : vector<4x1xf32> to vector<4x8xf32>
    %156 = arith.subf %148, %155 : vector<4x8xf32>
    %157 = arith.mulf %156, %156 : vector<4x8xf32>
    %cst_64 = arith.constant dense<0.000000e+00> : vector<4xf32>
    %158 = vector.multi_reduction <add>, %157, %cst_64 [1] : vector<4x8xf32> to vector<4xf32>
    %159 = vector.shape_cast %158 : vector<4xf32> to vector<4x1xf32>
    %cst_65 = arith.constant 1.250000e-01 : f32
    %160 = vector.broadcast %cst_65 : f32 to vector<4x1xf32>
    %161 = arith.mulf %159, %160 : vector<4x1xf32>
    %cst_66 = arith.constant 9.99999974E-6 : f32
    %162 = vector.broadcast %cst_66 : f32 to vector<4x1xf32>
    %163 = arith.addf %161, %162 : vector<4x1xf32>
    %164 = math.rsqrt %163 : vector<4x1xf32>
    %165 = vector.broadcast %164 : vector<4x1xf32> to vector<4x8xf32>
    %166 = arith.mulf %156, %165 : vector<4x8xf32>
    %167 = vector.broadcast %149 : vector<4x1xf32> to vector<4x8xf32>
    %168 = arith.mulf %166, %167 : vector<4x8xf32>
    %169 = vector.broadcast %150 : vector<4x1xf32> to vector<4x8xf32>
    %170 = arith.addf %168, %169 : vector<4x8xf32>
    %cst_67 = arith.constant 0.000000e+00 : f32
    %171 = vector.broadcast %cst_67 : f32 to vector<4x8xf32>
    %172 = arith.maximumf %170, %171 : vector<4x8xf32>
    %c56 = arith.constant 56 : index
    %c0_68 = arith.constant 0 : index
    %173 = vector.load %arg1[%c56, %c0_68] : memref<64x128xf32, #tpu.memory_space<vmem>>, vector<1x4xf32>
    %cst_69 = arith.constant dense<0.000000e+00> : vector<1x8xf32>
    %174 = tpu.matmul %173, %172, %cst_69 {dimension_numbers = #tpu.dot_dimension_numbers<[1], [0], [0], [1], [0, 0, 1, 1], [], []>, precision = #tpu.contract_precision<fp32>} : vector<1x4xf32>, vector<4x8xf32>, vector<1x8xf32> -> vector<1x8xf32>
    %c56_70 = arith.constant 56 : index
    %c64_71 = arith.constant 64 : index
    %175 = vector.load %arg1[%c56_70, %c64_71] : memref<64x128xf32, #tpu.memory_space<vmem>>, vector<1x1xf32>
    %176 = vector.broadcast %175 : vector<1x1xf32> to vector<1x8xf32>
    %177 = arith.addf %174, %176 : vector<1x8xf32>
    %178 = vector.extract_strided_slice %177 {offsets = [0, 0], sizes = [1, 1], strides = [1, 1]} : vector<1x8xf32> to vector<1x1xf32>
    %179 = vector.shape_cast %178 : vector<1x1xf32> to vector<1x1xf32>
    %180 = vector.broadcast %179 : vector<1x1xf32> to vector<16x16xf32>
    %c0_72 = arith.constant 0 : index
    %c0_73 = arith.constant 0 : index
    %c0_74 = arith.constant 0 : index
    %181 = vector.load %arg2[%c0_72, %c0_73, %c0_74] : memref<2x32x32xf32, #tpu.memory_space<vmem>>, vector<1x16x16xf32>
    %182 = vector.shape_cast %181 : vector<1x16x16xf32> to vector<16x16xf32>
    %183 = vector.shape_cast %180 : vector<16x16xf32> to vector<1x16x16xf32>
    tpu.vector_store %arg2[%c0_72, %c0_73, %c0_74], %183 {strides = array<i32>} : memref<2x32x32xf32, #tpu.memory_space<vmem>>, vector<1x16x16xf32>,
    %184 = vector.extract_strided_slice %177 {offsets = [0, 2], sizes = [1, 1], strides = [1, 1]} : vector<1x8xf32> to vector<1x1xf32>
    %185 = vector.shape_cast %184 : vector<1x1xf32> to vector<1x1xf32>
    %186 = vector.broadcast %185 : vector<1x1xf32> to vector<16x16xf32>
    %c0_75 = arith.constant 0 : index
    %c0_76 = arith.constant 0 : index
    %c16_77 = arith.constant 16 : index
    %187 = vector.load %arg2[%c0_75, %c0_76, %c16_77] : memref<2x32x32xf32, #tpu.memory_space<vmem>>, vector<1x16x16xf32>
    %188 = vector.shape_cast %187 : vector<1x16x16xf32> to vector<16x16xf32>
    %189 = vector.shape_cast %186 : vector<16x16xf32> to vector<1x16x16xf32>
    tpu.vector_store %arg2[%c0_75, %c0_76, %c16_77], %189 {strides = array<i32>} : memref<2x32x32xf32, #tpu.memory_space<vmem>>, vector<1x16x16xf32>,
    %190 = vector.extract_strided_slice %177 {offsets = [0, 4], sizes = [1, 1], strides = [1, 1]} : vector<1x8xf32> to vector<1x1xf32>
    %191 = vector.shape_cast %190 : vector<1x1xf32> to vector<1x1xf32>
    %192 = vector.broadcast %191 : vector<1x1xf32> to vector<16x16xf32>
    %c0_78 = arith.constant 0 : index
    %c16_79 = arith.constant 16 : index
    %c0_80 = arith.constant 0 : index
    %193 = vector.load %arg2[%c0_78, %c16_79, %c0_80] : memref<2x32x32xf32, #tpu.memory_space<vmem>>, vector<1x16x16xf32>
    %194 = vector.shape_cast %193 : vector<1x16x16xf32> to vector<16x16xf32>
    %195 = vector.shape_cast %192 : vector<16x16xf32> to vector<1x16x16xf32>
    tpu.vector_store %arg2[%c0_78, %c16_79, %c0_80], %195 {strides = array<i32>} : memref<2x32x32xf32, #tpu.memory_space<vmem>>, vector<1x16x16xf32>,
    %196 = vector.extract_strided_slice %177 {offsets = [0, 6], sizes = [1, 1], strides = [1, 1]} : vector<1x8xf32> to vector<1x1xf32>
    %197 = vector.shape_cast %196 : vector<1x1xf32> to vector<1x1xf32>
    %198 = vector.broadcast %197 : vector<1x1xf32> to vector<16x16xf32>
    %c0_81 = arith.constant 0 : index
    %c16_82 = arith.constant 16 : index
    %c16_83 = arith.constant 16 : index
    %199 = vector.load %arg2[%c0_81, %c16_82, %c16_83] : memref<2x32x32xf32, #tpu.memory_space<vmem>>, vector<1x16x16xf32>
    %200 = vector.shape_cast %199 : vector<1x16x16xf32> to vector<16x16xf32>
    %201 = vector.shape_cast %198 : vector<16x16xf32> to vector<1x16x16xf32>
    tpu.vector_store %arg2[%c0_81, %c16_82, %c16_83], %201 {strides = array<i32>} : memref<2x32x32xf32, #tpu.memory_space<vmem>>, vector<1x16x16xf32>,
    %202 = vector.extract_strided_slice %177 {offsets = [0, 1], sizes = [1, 1], strides = [1, 1]} : vector<1x8xf32> to vector<1x1xf32>
    %203 = vector.shape_cast %202 : vector<1x1xf32> to vector<1x1xf32>
    %204 = vector.broadcast %203 : vector<1x1xf32> to vector<16x16xf32>
    %c1 = arith.constant 1 : index
    %c0_84 = arith.constant 0 : index
    %c0_85 = arith.constant 0 : index
    %205 = vector.load %arg2[%c1, %c0_84, %c0_85] : memref<2x32x32xf32, #tpu.memory_space<vmem>>, vector<1x16x16xf32>
    %206 = vector.shape_cast %205 : vector<1x16x16xf32> to vector<16x16xf32>
    %207 = vector.shape_cast %204 : vector<16x16xf32> to vector<1x16x16xf32>
    tpu.vector_store %arg2[%c1, %c0_84, %c0_85], %207 {strides = array<i32>} : memref<2x32x32xf32, #tpu.memory_space<vmem>>, vector<1x16x16xf32>,
    %208 = vector.extract_strided_slice %177 {offsets = [0, 3], sizes = [1, 1], strides = [1, 1]} : vector<1x8xf32> to vector<1x1xf32>
    %209 = vector.shape_cast %208 : vector<1x1xf32> to vector<1x1xf32>
    %210 = vector.broadcast %209 : vector<1x1xf32> to vector<16x16xf32>
    %c1_86 = arith.constant 1 : index
    %c0_87 = arith.constant 0 : index
    %c16_88 = arith.constant 16 : index
    %211 = vector.load %arg2[%c1_86, %c0_87, %c16_88] : memref<2x32x32xf32, #tpu.memory_space<vmem>>, vector<1x16x16xf32>
    %212 = vector.shape_cast %211 : vector<1x16x16xf32> to vector<16x16xf32>
    %213 = vector.shape_cast %210 : vector<16x16xf32> to vector<1x16x16xf32>
    tpu.vector_store %arg2[%c1_86, %c0_87, %c16_88], %213 {strides = array<i32>} : memref<2x32x32xf32, #tpu.memory_space<vmem>>, vector<1x16x16xf32>,
    %214 = vector.extract_strided_slice %177 {offsets = [0, 5], sizes = [1, 1], strides = [1, 1]} : vector<1x8xf32> to vector<1x1xf32>
    %215 = vector.shape_cast %214 : vector<1x1xf32> to vector<1x1xf32>
    %216 = vector.broadcast %215 : vector<1x1xf32> to vector<16x16xf32>
    %c1_89 = arith.constant 1 : index
    %c16_90 = arith.constant 16 : index
    %c0_91 = arith.constant 0 : index
    %217 = vector.load %arg2[%c1_89, %c16_90, %c0_91] : memref<2x32x32xf32, #tpu.memory_space<vmem>>, vector<1x16x16xf32>
    %218 = vector.shape_cast %217 : vector<1x16x16xf32> to vector<16x16xf32>
    %219 = vector.shape_cast %216 : vector<16x16xf32> to vector<1x16x16xf32>
    tpu.vector_store %arg2[%c1_89, %c16_90, %c0_91], %219 {strides = array<i32>} : memref<2x32x32xf32, #tpu.memory_space<vmem>>, vector<1x16x16xf32>,
    %220 = vector.extract_strided_slice %177 {offsets = [0, 7], sizes = [1, 1], strides = [1, 1]} : vector<1x8xf32> to vector<1x1xf32>
    %221 = vector.shape_cast %220 : vector<1x1xf32> to vector<1x1xf32>
    %222 = vector.broadcast %221 : vector<1x1xf32> to vector<16x16xf32>
    %c1_92 = arith.constant 1 : index
    %c16_93 = arith.constant 16 : index
    %c16_94 = arith.constant 16 : index
    %223 = vector.load %arg2[%c1_92, %c16_93, %c16_94] : memref<2x32x32xf32, #tpu.memory_space<vmem>>, vector<1x16x16xf32>
    %224 = vector.shape_cast %223 : vector<1x16x16xf32> to vector<16x16xf32>
    %225 = vector.shape_cast %222 : vector<16x16xf32> to vector<1x16x16xf32>
    tpu.vector_store %arg2[%c1_92, %c16_93, %c16_94], %225 {strides = array<i32>} : memref<2x32x32xf32, #tpu.memory_space<vmem>>, vector<1x16x16xf32>,
    return
  }
}

</mosaic_0001>

<bundles_post_ra>
// kernel: forward.1
= control target key start
LH: loop header
LB: loop body
LE: loop exit
PB: predicated region body
PF: predicated region fallthrough
CT: control target
= control target key end

     0   :  { %vm25_vm0 = vcmask 1043456   ;;  %v9246_v7 = vmov 0.0   ;;  %vm21_vm1 = vcmask 97280   ;;  %s9692_s0 = inlined_call_operand.vmem [shape: f32[12,512], index: 0, kind: input, shape index: {}]   ;;  %s9693_s1 = inlined_call_operand.vmem [shape: f32[64,128], index: 1, kind: input, shape index: {}]   ;;  %s9694_s2 = inlined_call_operand.hbm [shape: f32[2,32,32], index: 2, kind: output, shape index: {}]  }
   0x1   :  { %v14_v0 = vld [vmem:[%s9692_s0 + $0x8] sm:$0xff]  ;;  %v13_v2 = vld [vmem:[%s9692_s0] sm:$0xff]  ;;  %106 = vmatprep.mubr.f32.mxu1 %v9246_v7  ;;  %8340 = vmatprep.subr.mxu0 %v9246_v7 }
   0x2   :  { %v18_v1 = vld [vmem:[%s9692_s0 + $0x28] sm:$0xf]  ;;  %v38_v4 = vand.u32 4294901760, %v14_v0  ;;  %v17_v5 = vld [vmem:[%s9692_s0 + $0x20] sm:$0xf]  ;;  %v40_v6 = vand.u32 4294901760, %v13_v2 }
   0x3   :  { %v30_v3 = vsel %vm25_vm0, %v18_v1, 0  ;;  %v27_v9 = vsel %vm25_vm0, %v17_v5, 0  ;;  %v9303_v10 = vld [vmem:[%s9693_s1] sm:$0xf] }
   0x4   :  { %v42_v8 = vand.u32 4294901760, %v30_v3  ;;  %v119_v11 = vsub.f32 %v14_v0, %v38_v4  ;;  %v44_v12 = vand.u32 4294901760, %v27_v9  ;;  %v125_v13 = vsub.f32 %v13_v2, %v40_v6 }
   0x5   :  { %v23_v14 = vsel %vm21_vm1, %v9303_v10, 0 }
   0x6   :  { %v8820_v15 = vpack.c.bf16 %v42_v8, %v38_v4  ;;  %v131_v16 = vsub.f32 %v30_v3, %v42_v8  ;;  %v9306_v17 = vand.u32 4294901760, %v23_v14 }
   0x7   :  { %7 = vsyncpa [#allocation3], 0  ;;  %v9308_v18 = vpack.c.bf16 %v44_v12, %v40_v6  ;;  %v137_v19 = vsub.f32 %v27_v9, %v44_v12  ;;  %v120_v20 = vand.u32 4294901760, %v119_v11  ;;  %v126_v21 = vand.u32 4294901760, %v125_v13  ;;  %v20_v40 = vld [vmem:[%s9692_s0 + $0x38] sm:$0xf] }
   0x8   :  { %8821 = vmatprep.subr.bf16.mxu1 %v8820_v15  ;;  %v9311_v22 = vsub.f32 %v23_v14, %v9306_v17  ;;  %v132_v23 = vand.u32 4294901760, %v131_v16  ;;  %v8828_v37 = vpack.c.bf16 %v131_v16, %v119_v11  ;;  %v16_v42 = vld [vmem:[%s9692_s0 + $0x18] sm:$0xff]  ;;  %v36_v43 = vsel %vm25_vm0, %v20_v40, 0  ;;  %v19_v44 = vld [vmem:[%s9692_s0 + $0x30] sm:$0xf]  ;;  %s9249_s28 = smov 120  }
   0x9   :  { %8823 = vmatpush1.bf16.msra.mxu1 %v9308_v18  ;;  %v121_v24 = vsub.f32 %v119_v11, %v120_v20  ;;  %v127_v25 = vsub.f32 %v125_v13, %v126_v21  ;;  %v138_v26 = vand.u32 4294901760, %v137_v19  ;;  %v8830_v39 = vpack.c.bf16 %v137_v19, %v125_v13  ;;  %v15_v47 = vld [vmem:[%s9692_s0 + $0x10] sm:$0xff]  ;;  %s9250_s29 = smov 124   ;;  %s9252_s30 = smov 116  }
   0xa   :  { %v9315_v27 = vand.u32 4294901760, %v9311_v22  ;;  %v133_v28 = vsub.f32 %v131_v16, %v132_v23  ;;  %v8836_v41 = vpack.c.bf16 %v132_v23, %v120_v20  ;;  %v529_v45 = vand.u32 4294901760, %v16_v42  ;;  %s9253_s7 = smov 96   ;;  %s9254_s8 = smov 112  }
   0xb   :  { %v122_v29 = vand.u32 4294901760, %v121_v24  ;;  %v128_v30 = vand.u32 4294901760, %v127_v25  ;;  %v139_v31 = vsub.f32 %v137_v19, %v138_v26  ;;  %v533_v46 = vand.u32 4294901760, %v36_v43  ;;  %s9255_s9 = smov 64   ;;  %s9256_s10 = smov 104  }
   0xc   :  { %v110_v32 = vsub.f32 %v9311_v22, %v9315_v27  ;;  %v134_v33 = vand.u32 4294901760, %v133_v28  ;;  %v33_v48 = vsel %vm25_vm0, %v19_v44, 0  ;;  %v8838_v49 = vpack.c.bf16 %v138_v26, %v126_v21  ;;  %s9257_s11 = smov 32   ;;  %s9258_s16 = smov 80  }
   0xd   :  { %v140_v34 = vand.u32 4294901760, %v139_v31  ;;  %v531_v50 = vand.u32 4294901760, %v15_v47  ;;  %v535_v51 = vand.u32 4294901760, %v33_v48  ;;  %v610_v52 = vsub.f32 %v16_v42, %v529_v45  ;;  %s9261_s21 = smov 127   ;;  %s9262_s22 = smov 122  }
   0xe   :  { %v9319_v35 = vand.u32 4294901760, %v110_v32  ;;  %v8824_v36 = vpack.c.bf16 %v134_v33, %v122_v29  ;;  %v622_v53 = vsub.f32 %v36_v43, %v533_v46  ;;  %v8844_v60 = vpack.c.bf16 %v533_v46, %v529_v45  ;;  %s9263_s23 = smov 123   ;;  %s9264_s24 = smov 125  }
   0xf   :  { %v8826_v38 = vpack.c.bf16 %v140_v34, %v128_v30  ;;  %v616_v54 = vsub.f32 %v15_v47, %v531_v50  ;;  %v628_v55 = vsub.f32 %v33_v48, %v535_v51  ;;  %v611_v56 = vand.u32 4294901760, %v610_v52  ;;  %s9265_s25 = smov 121   ;;  %s9266_s3 = smov [#allocation2]  }
  0x10   :  { %112 = vmatmul.mubr.f32.vlgmr.msra.gmra.mrb[0].mxu1 %v9319_v35  ;;  %8825 = vmatprep.subr.bf16.mxu1 %v8824_v36  ;;  %v623_v57 = vand.u32 4294901760, %v622_v53  ;;  %v8846_v3 = vpack.c.bf16 %v535_v51, %v531_v50  ;;  %v8852_v9 = vpack.c.bf16 %v622_v53, %v610_v52  ;;  %v9247_v26 = vmov 64   ;;  %s8083_s4 = sshll.u32 %s9266_s3, 4  ;;  %s8084_s4 = int_to_ptr.vmem [resolvable:$true] %s8083_s4 }
  0x11   :  { %8827 = vmatpush1.bf16.msra.mxu1 %v8826_v38  ;;  %202 = vmatprep.mubr.f32.mxu1 %v9246_v7  ;;  %v617_v58 = vand.u32 4294901760, %v616_v54  ;;  %v629_v59 = vand.u32 4294901760, %v628_v55  ;;  %v612_v61 = vsub.f32 %v610_v52, %v611_v56  ;;  %v8854_v11 = vpack.c.bf16 %v628_v55, %v616_v54  ;;  %p9227_p1 = scmp.lt.s32.totalorder %s8084_s4, %s8084_s4 }
  0x12   :  { %8829 = vmatprep.subr.bf16.mxu1 %v8828_v37  ;;  %v624_v62 = vsub.f32 %v622_v53, %v623_v57  ;;  %v8860_v12 = vpack.c.bf16 %v623_v57, %v611_v56  ;;  %9200 = vset.pattern.permute.xlu1 %v9247_v26  ;;  %vm9251_vm2 = vmmov 0   ;;  %vm1078_vm3 = vcmask 31744  }
  0x13   :  { %v618_v63 = vsub.f32 %v616_v54, %v617_v58  ;;  %v630_v0 = vsub.f32 %v628_v55, %v629_v59  ;;  %v613_v1 = vand.u32 4294901760, %v612_v61  ;;  %v8862_v13 = vpack.c.bf16 %v629_v59, %v617_v58  ;;  %1055 = vperm.xlu1 %9200, %v9303_v10   ;;  %8342 = vmatprep.mubr.msk.f32.mxu0 %vm9251_vm2, %v9246_v7 }
  0x14   :  { %v625_v2 = vand.u32 4294901760, %v624_v62  ;;  %vm2923_vm4 = vcmask 64512   ;;  %vm4914_vm5 = vcmask 261120   ;;  %vm4979_vm6 = vcmask 130048  }
  0x15   :  { %v619_v4 = vand.u32 4294901760, %v618_v63  ;;  %v631_v5 = vand.u32 4294901760, %v630_v0  ;;  %vm7539_vm7 = vcmask 60416   ;;  %vm8032_vm8 = vcmask 261248  }
  0x16   :  { %v8848_v6 = vpack.c.bf16 %v625_v2, %v613_v1 }
  0x17   :  { %v8850_v8 = vpack.c.bf16 %v631_v5, %v619_v4 }
  0x18   :  { %204 = vmatmul.mubr.f32.vlgmr.msra.gmra.mrb[0].mxu1 %v9306_v17 }
  0x19   :  { %8831 = vmatpush1.bf16.msra.mxu1 %v8830_v39  ;;  %282 = vmatprep.mubr.f32.mxu1 %v9246_v7 }
  0x1a   :  { %8833 = vmatprep.subr.bf16.mxu1 %v8820_v15 }
  0x20   :  { %285 = vmatmul.mubr.f32.vlgmr.msra.gmra.mrb[0].mxu1 %v9311_v22 }
  0x21   :  { %8835 = vmatpush1.bf16.msra.mxu1 %v9308_v18  ;;  %359 = vmatprep.mubr.f32.mxu1 %v9246_v7 }
  0x22   :  { %8837 = vmatprep.subr.bf16.mxu1 %v8836_v41 }
  0x28   :  { %363 = vmatmul.mubr.f32.vlgmr.msra.gmra.mrb[0].mxu1 %v9315_v27 }
  0x29   :  { %8839 = vmatpush1.bf16.msra.mxu1 %v8838_v49  ;;  %445 = vmatprep.mubr.f32.mxu1 %v9246_v7 }
  0x2a   :  { %8841 = vmatprep.subr.bf16.mxu1 %v8820_v15 }
  0x30   :  { %447 = vmatmul.mubr.f32.vlgmr.msra.gmra.mrb[0].mxu1 %v9306_v17 }
  0x31   :  { %8843 = vmatpush1.bf16.msra.mxu1 %v9308_v18  ;;  %521 = vmatprep.mubr.f32.mxu1 %v9246_v7 }
  0x32   :  { %8845 = vmatprep.subr.bf16.mxu1 %v8844_v60 }
  0x38   :  { %523 = vmatmul.mubr.f32.vlgmr.msra.gmra.mrb[0].mxu1 %v9306_v17 }
  0x39   :  { %8847 = vmatpush1.bf16.msra.mxu1 %v8846_v3  ;;  %597 = vmatprep.mubr.f32.mxu1 %v9246_v7 }
  0x3a   :  { %8849 = vmatprep.subr.bf16.mxu1 %v8848_v6 }
  0x3c   :  { %603 = vmatmul.mubr.f32.vlgmr.msra.gmra.mrb[2].mxu1 %v9319_v35 }
  0x3d   :  { %8851 = vmatpush1.bf16.msra.mxu1 %v8850_v8  ;;  %693 = vmatprep.mubr.f32.mxu1 %v9246_v7 }
  0x3e   :  { %8853 = vmatprep.subr.bf16.mxu1 %v8852_v9 }
  0x44   :  { %695 = vmatmul.mubr.f32.vlgmr.msra.gmra.mrb[2].mxu1 %v9306_v17 }
  0x45   :  { %8855 = vmatpush1.bf16.msra.mxu1 %v8854_v11  ;;  %773 = vmatprep.mubr.f32.mxu1 %v9246_v7 }
  0x46   :  { %8857 = vmatprep.subr.bf16.mxu1 %v8844_v60 }
  0x4c   :  { %776 = vmatmul.mubr.f32.vlgmr.msra.gmra.mrb[2].mxu1 %v9311_v22 }
  0x4d   :  { %8859 = vmatpush1.bf16.msra.mxu1 %v8846_v3  ;;  %850 = vmatprep.mubr.f32.mxu1 %v9246_v7 }
  0x4e   :  { %8861 = vmatprep.subr.bf16.mxu1 %v8860_v12 }
  0x54   :  { %854 = vmatmul.mubr.f32.vlgmr.msra.gmra.mrb[2].mxu1 %v9315_v27  ;;  %v9373_v27 = vld [vmem:[%s9693_s1 + $0x8] sm:$0xff] }
  0x55   :  { %8863 = vmatpush1.bf16.msra.mxu1 %v8862_v13  ;;  %936 = vmatprep.mubr.f32.mxu1 %v9246_v7 }
  0x56   :  { %8865 = vmatprep.subr.bf16.mxu1 %v8844_v60 }
  0x5c   :  { %938 = vmatmul.mubr.f32.vlgmr.msra.gmra.mrb[2].mxu1 %v9306_v17 }
  0x5d   :  { %8867 = vmatpush1.bf16.msra.mxu1 %v8846_v3  ;;  %1012 = vmatprep.mubr.f32.mxu1 %v9246_v7 }
  0x64   :  { %1014 = vmatmul.mubr.f32.vlgmr.msra.gmra.mrb[2].mxu1 %v9306_v17  ;;  %v9248_v17 = vmov 65  }
  0x65   :  { %9203 = vset.pattern.permute.xlu0 %v9248_v17  ;;  %9201 = vset.pattern.permute.xlu1 %v9248_v17 }
  0x66   :  { %1063 = vperm.xlu1 %9201, %v9303_v10  }
  0x6a   :  { %9202 = vset.pattern.permute.xlu1 %v9247_v26 }
  0x6b   :  { %1981 = vrot.lane.b32.xlu1 %v9373_v27, %s9249_s28 }
  0x6f   :  { %2435 = vrot.lane.b32.xlu1 %v9373_v27, %s9252_s30 }
  0x92   :  { %v1056_v50 = vpop.permute.xlu1 %1055 }
  0xe5   :  { %v1064_v56 = vpop.permute.xlu1 %1063 }
 0x10b   :  { %v524_v14 = vpop.f32.mrb[0].mxu1 }
 0x10c   :  { %v1020_v15 = vsel %vm25_vm0, %v524_v14, 0.0  ;;  %v526_v16 = vpop.f32.mrb[1].mxu1 }
 0x10d   :  { %v1021_v18 = vsel %vm25_vm0, %v526_v16, 0.0 }
 0x10e   :  { %v1022_v19 = vadd.f32 %v1021_v18, %v1020_v15  ;;  %v1530_v15 = vsel %vm1078_vm3, %v9373_v27, 0 }
 0x137   :  { %v1015_v20 = vpop.f32.mrb[2].mxu1 }
 0x138   :  { %v1023_v21 = vsel %vm25_vm0, %v1015_v20, 0.0  ;;  %v1017_v22 = vpop.f32.mrb[3].mxu1 }
 0x139   :  { %v1024_v23 = vadd.f32 %v1023_v21, %v1022_v19  ;;  %v1025_v24 = vsel %vm25_vm0, %v1017_v22, 0.0 }
 0x13b   :  { %v1026_v25 = vadd.f32 %v1025_v24, %v1024_v23 }
 0x13d   :  { %1027 = vadd.xlane.f32.xlu0 %v1026_v25 }
 0x1ca   :  { %v1028_v28 = vpop.xlane.xlu0 %1027 }
 0x1cb   :  { %v1029_v29 = vmul.f32 0.001953125, %v1028_v28 }
 0x1cd   :  { %v9377_v30 = vsub.f32 %v524_v14, %v1029_v29  ;;  %v1031_v31 = vsub.f32 %v526_v16, %v1029_v29  ;;  %v1032_v32 = vsub.f32 %v1015_v20, %v1029_v29  ;;  %v1033_v33 = vsub.f32 %v1017_v22, %v1029_v29 }
 0x1ce   :  { %v1601_v16 = vand.u32 4294901760, %v1530_v15 }
 0x1cf   :  { %v1034_v10 = vmul.f32 %v9377_v30, %v9377_v30  ;;  %v1035_v34 = vmul.f32 %v1031_v31, %v1031_v31  ;;  %v1036_v35 = vmul.f32 %v1032_v32, %v1032_v32  ;;  %v1037_v36 = vmul.f32 %v1033_v33, %v1033_v33 }
 0x1d0   :  { %v1602_v20 = vsub.f32 %v1530_v15, %v1601_v16 }
 0x1d1   :  { %v1038_v37 = vsel %vm25_vm0, %v1034_v10, 0.0  ;;  %v1039_v38 = vsel %vm25_vm0, %v1035_v34, 0.0  ;;  %v1041_v40 = vsel %vm25_vm0, %v1036_v35, 0.0  ;;  %v1043_v42 = vsel %vm25_vm0, %v1037_v36, 0.0 }
 0x1d2   :  { %v1040_v39 = vadd.f32 %v1039_v38, %v1038_v37  ;;  %v1603_v22 = vand.u32 4294901760, %v1602_v20 }
 0x1d4   :  { %v1042_v41 = vadd.f32 %v1041_v40, %v1040_v39  ;;  %v1604_v24 = vsub.f32 %v1602_v20, %v1603_v22 }
 0x1d6   :  { %v1044_v43 = vadd.f32 %v1043_v42, %v1042_v41  ;;  %v1605_v28 = vand.u32 4294901760, %v1604_v24 }
 0x1d8   :  { %1045 = vadd.xlane.f32.xlu0 %v1044_v43 }
 0x1ee   :  { %1076 = vrot.lane.b32.xlu0 %v9373_v27, %s9250_s29 }
 0x265   :  { %v1046_v44 = vpop.xlane.xlu0 %1045 }
 0x266   :  { %v1047_v45 = vmul.f32 0.001953125, %v1046_v44 }
 0x268   :  { %v1048_v46 = vadd.f32 1e-05, %v1047_v45 }
 0x269   :  { %v1077_v47 = vpop.permute.xlu0 %1076 }
 0x26a   :  { %9208 = vrsqrt.f32 %v1048_v46  ;;  %v1079_v48 = vsel %vm1078_vm3, %v1077_v47, 0 }
 0x26b   :  { %v1150_v49 = vand.u32 4294901760, %v1079_v48 }
 0x26d   :  { %v1151_v51 = vsub.f32 %v1079_v48, %v1150_v49 }
 0x26f   :  { %v1152_v57 = vand.u32 4294901760, %v1151_v51 }
 0x271   :  { %v1153_v1 = vsub.f32 %v1151_v51, %v1152_v57 }
 0x273   :  { %v1154_v4 = vand.u32 4294901760, %v1153_v1 }
 0x274   :  { %v9209_v52 = vpop.eup %9208 }
 0x275   :  { %v1051_v53 = vmul.f32 %v9209_v52, %v1031_v31  ;;  %v1052_v54 = vmul.f32 %v9209_v52, %v1032_v32  ;;  %v1053_v55 = vmul.f32 %v9209_v52, %v1033_v33  ;;  %v1050_v11 = vmul.f32 %v9209_v52, %v9377_v30  ;;  %v1982_v31 = vpop.permute.xlu1 %1981 }
 0x276   :  { %v1983_v32 = vsel %vm1078_vm3, %v1982_v31, 0 }
 0x277   :  { %v1059_v58 = vmul.f32 %v1056_v50, %v1051_v53  ;;  %v1060_v59 = vmul.f32 %v1056_v50, %v1052_v54  ;;  %v1061_v60 = vmul.f32 %v1056_v50, %v1053_v55  ;;  %v1058_v12 = vmul.f32 %v1056_v50, %v1050_v11 }
 0x278   :  { %v2054_v10 = vand.u32 4294901760, %v1983_v32 }
 0x279   :  { %v1067_v61 = vadd.f32 %v1064_v56, %v1059_v58  ;;  %v9391_v62 = vadd.f32 %v1064_v56, %v1060_v59  ;;  %v9393_v63 = vadd.f32 %v1064_v56, %v1061_v60  ;;  %v1066_v13 = vadd.f32 %v1064_v56, %v1058_v12  ;;  %v2436_v44 = vpop.permute.xlu1 %2435 }
 0x27a   :  { %v2055_v35 = vsub.f32 %v1983_v32, %v2054_v10  ;;  %v2437_v45 = vsel %vm1078_vm3, %v2436_v44, 0 }
 0x27b   :  { %v1071_v0 = vmax.f32 %v1067_v61, 0.0  ;;  %v1070_v14 = vmax.f32 %v1066_v13, 0.0  ;;  %v1072_v30 = vmax.f32 %v9391_v62, 0.0  ;;  %v1073_v43 = vmax.f32 %v9393_v63, 0.0  ;;  %v9479_v63 = vld [vmem:[%s9693_s1 + $0x10] sm:$0xff] }
 0x27c   :  { %v2056_v37 = vand.u32 4294901760, %v2055_v35  ;;  %v2508_v47 = vand.u32 4294901760, %v2437_v45 }
 0x27d   :  { %v1082_v2 = vsel %vm25_vm0, %v1071_v0, 0  ;;  %v1533_v18 = vsel %vm25_vm0, %v1070_v14, 0  ;;  %v1986_v33 = vsel %vm25_vm0, %v1072_v30, 0  ;;  %v2440_v46 = vsel %vm25_vm0, %v1073_v43, 0  ;;  %v9486_v0 = vld [vmem:[%s9693_s1 + $0x18] sm:$0xff] }
 0x27e   :  { %v1085_v3 = vand.u32 4294901760, %v1082_v2  ;;  %v1536_v19 = vand.u32 4294901760, %v1533_v18  ;;  %v1989_v34 = vand.u32 4294901760, %v1986_v33  ;;  %v2057_v39 = vsub.f32 %v2055_v35, %v2056_v37 }
 0x27f   :  { %v2443_v48 = vand.u32 4294901760, %v2440_v46 }
 0x280   :  { %8341 = vmatpush3.msra.mxu0 %v1085_v3  ;;  %v1162_v5 = vsub.f32 %v1082_v2, %v1085_v3  ;;  %v1613_v21 = vsub.f32 %v1533_v18, %v1536_v19  ;;  %v2066_v36 = vsub.f32 %v1986_v33, %v1989_v34  ;;  %v2058_v41 = vand.u32 4294901760, %v2057_v39 }
 0x281   :  { %8343 = vmatmul.mubr.f32.vlgmr.msra.gmra.mrb[0].mxu0 %v1154_v4  ;;  %8345 = vmatprep.subr.mxu0 %v9246_v7  ;;  %v2520_v50 = vsub.f32 %v2440_v46, %v2443_v48 }
 0x282   :  { %v1163_v6 = vand.u32 4294901760, %v1162_v5  ;;  %8347 = vmatprep.mubr.msk.f32.mxu0 %vm9251_vm2, %v9246_v7  ;;  %v1614_v23 = vand.u32 4294901760, %v1613_v21  ;;  %v2067_v38 = vand.u32 4294901760, %v2066_v36 }
 0x283   :  { %v2521_v52 = vand.u32 4294901760, %v2520_v50 }
 0x284   :  { %v1164_v8 = vsub.f32 %v1162_v5, %v1163_v6  ;;  %v1615_v25 = vsub.f32 %v1613_v21, %v1614_v23  ;;  %v2068_v40 = vsub.f32 %v2066_v36, %v2067_v38 }
 0x285   :  { %v2522_v54 = vsub.f32 %v2520_v50, %v2521_v52 }
 0x286   :  { %v1165_v9 = vand.u32 4294901760, %v1164_v8  ;;  %v1616_v29 = vand.u32 4294901760, %v1615_v25  ;;  %v2069_v42 = vand.u32 4294901760, %v2068_v40 }
 0x287   :  { %v2523_v56 = vand.u32 4294901760, %v2522_v54 }
 0x288   :  { %8346 = vmatpush3.msra.mxu0 %v1165_v9 }
 0x289   :  { %8348 = vmatmul.mubr.f32.vlgmr.msra.gmra.mrb[0].mxu0 %v1150_v49  ;;  %8350 = vmatprep.subr.mxu0 %v9246_v7 }
 0x28a   :  { %8351 = vmatpush3.msra.mxu0 %v1162_v5  ;;  %8352 = vmatprep.mubr.msk.f32.mxu0 %vm9251_vm2, %v9246_v7 }
 0x28b   :  { %8355 = vmatprep.subr.mxu0 %v9246_v7 }
 0x291   :  { %8353 = vmatmul.mubr.f32.vlgmr.msra.gmra.mrb[0].mxu0 %v1151_v51 }
 0x292   :  { %8356 = vmatpush3.msra.mxu0 %v1085_v3  ;;  %8357 = vmatprep.mubr.msk.f32.mxu0 %vm9251_vm2, %v9246_v7 }
 0x293   :  { %8360 = vmatprep.subr.mxu0 %v9246_v7 }
 0x299   :  { %8358 = vmatmul.mubr.f32.vlgmr.msra.gmra.mrb[0].mxu0 %v1152_v57 }
 0x29a   :  { %8361 = vmatpush3.msra.mxu0 %v1163_v6  ;;  %8362 = vmatprep.mubr.msk.f32.mxu0 %vm9251_vm2, %v9246_v7 }
 0x29b   :  { %8365 = vmatprep.subr.mxu0 %v9246_v7 }
 0x2a1   :  { %8363 = vmatmul.mubr.f32.vlgmr.msra.gmra.mrb[0].mxu0 %v1150_v49 }
 0x2a2   :  { %8366 = vmatpush3.msra.mxu0 %v1085_v3  ;;  %8367 = vmatprep.mubr.msk.f32.mxu0 %vm9251_vm2, %v9246_v7 }
 0x2a3   :  { %8370 = vmatprep.subr.mxu0 %v9246_v7 }
 0x2a9   :  { %8368 = vmatmul.mubr.f32.vlgmr.msra.gmra.mrb[0].mxu0 %v1150_v49  ;;  %v2509_v49 = vsub.f32 %v2437_v45, %v2508_v47 }
 0x2aa   :  { %8371 = vmatpush3.msra.mxu0 %v1536_v19  ;;  %8372 = vmatprep.mubr.msk.f32.mxu0 %vm9251_vm2, %v9246_v7 }
 0x2ab   :  { %8375 = vmatprep.subr.mxu0 %v9246_v7  ;;  %v2510_v51 = vand.u32 4294901760, %v2509_v49 }
 0x2ad   :  { %v2511_v53 = vsub.f32 %v2509_v49, %v2510_v51 }
 0x2af   :  { %v2512_v55 = vand.u32 4294901760, %v2511_v53 }
 0x2b1   :  { %8373 = vmatmul.mubr.f32.vlgmr.msra.gmra.mrb[0].mxu0 %v1605_v28 }
 0x2b2   :  { %8376 = vmatpush3.msra.mxu0 %v1616_v29  ;;  %8377 = vmatprep.mubr.msk.f32.mxu0 %vm9251_vm2, %v9246_v7 }
 0x2b3   :  { %8380 = vmatprep.subr.mxu0 %v9246_v7 }
 0x2b9   :  { %8378 = vmatmul.mubr.f32.vlgmr.msra.gmra.mrb[0].mxu0 %v1601_v16 }
 0x2ba   :  { %8381 = vmatpush3.msra.mxu0 %v1613_v21  ;;  %8382 = vmatprep.mubr.msk.f32.mxu0 %vm9251_vm2, %v9246_v7 }
 0x2bb   :  { %8385 = vmatprep.subr.mxu0 %v9246_v7 }
 0x2c1   :  { %8383 = vmatmul.mubr.f32.vlgmr.msra.gmra.mrb[0].mxu0 %v1602_v20 }
 0x2c2   :  { %8386 = vmatpush3.msra.mxu0 %v1536_v19  ;;  %8387 = vmatprep.mubr.msk.f32.mxu0 %vm9251_vm2, %v9246_v7 }
 0x2c3   :  { %8390 = vmatprep.subr.mxu0 %v9246_v7 }
 0x2c9   :  { %8388 = vmatmul.mubr.f32.vlgmr.msra.gmra.mrb[0].mxu0 %v1603_v22 }
 0x2ca   :  { %8391 = vmatpush3.msra.mxu0 %v1614_v23  ;;  %8392 = vmatprep.mubr.msk.f32.mxu0 %vm9251_vm2, %v9246_v7 }
 0x2cb   :  { %8395 = vmatprep.subr.mxu0 %v9246_v7 }
 0x2d1   :  { %8393 = vmatmul.mubr.f32.vlgmr.msra.gmra.mrb[0].mxu0 %v1601_v16 }
 0x2d2   :  { %8396 = vmatpush3.msra.mxu0 %v1536_v19  ;;  %8397 = vmatprep.mubr.msk.f32.mxu0 %vm9251_vm2, %v9246_v7 }
 0x2d3   :  { %8400 = vmatprep.subr.mxu0 %v9246_v7 }
 0x2d9   :  { %8398 = vmatmul.mubr.f32.vlgmr.msra.gmra.mrb[0].mxu0 %v1601_v16 }
 0x2da   :  { %8401 = vmatpush3.msra.mxu0 %v1989_v34  ;;  %8402 = vmatprep.mubr.msk.f32.mxu0 %vm9251_vm2, %v9246_v7 }
 0x2db   :  { %8405 = vmatprep.subr.mxu0 %v9246_v7 }
 0x2e1   :  { %8403 = vmatmul.mubr.f32.vlgmr.msra.gmra.mrb[0].mxu0 %v2058_v41 }
 0x2e2   :  { %8406 = vmatpush3.msra.mxu0 %v2069_v42  ;;  %8407 = vmatprep.mubr.msk.f32.mxu0 %vm9251_vm2, %v9246_v7 }
 0x2e3   :  { %8410 = vmatprep.subr.mxu0 %v9246_v7 }
 0x2e9   :  { %8408 = vmatmul.mubr.f32.vlgmr.msra.gmra.mrb[0].mxu0 %v2054_v10 }
 0x2ea   :  { %8411 = vmatpush3.msra.mxu0 %v2066_v36  ;;  %8412 = vmatprep.mubr.msk.f32.mxu0 %vm9251_vm2, %v9246_v7 }
 0x2eb   :  { %8415 = vmatprep.subr.mxu0 %v9246_v7 }
 0x2f1   :  { %8413 = vmatmul.mubr.f32.vlgmr.msra.gmra.mrb[0].mxu0 %v2055_v35 }
 0x2f2   :  { %8416 = vmatpush3.msra.mxu0 %v1989_v34  ;;  %8417 = vmatprep.mubr.msk.f32.mxu0 %vm9251_vm2, %v9246_v7 }
 0x2f3   :  { %8420 = vmatprep.subr.mxu0 %v9246_v7 }
 0x2f9   :  { %8418 = vmatmul.mubr.f32.vlgmr.msra.gmra.mrb[0].mxu0 %v2056_v37 }
 0x2fa   :  { %8421 = vmatpush3.msra.mxu0 %v2067_v38  ;;  %8422 = vmatprep.mubr.msk.f32.mxu0 %vm9251_vm2, %v9246_v7  ;;  %v3419_v38 = vsel %vm2923_vm4, %v9486_v0, 0 }
 0x2fb   :  { %8425 = vmatprep.subr.mxu0 %v9246_v7  ;;  %v3497_v40 = vand.u32 4294901760, %v3419_v38 }
 0x2fd   :  { %v3498_v43 = vsub.f32 %v3419_v38, %v3497_v40 }
 0x2ff   :  { %v3499_v46 = vand.u32 4294901760, %v3498_v43 }
 0x301   :  { %8423 = vmatmul.mubr.f32.vlgmr.msra.gmra.mrb[0].mxu0 %v2054_v10 }
 0x302   :  { %8426 = vmatpush3.msra.mxu0 %v1989_v34  ;;  %8427 = vmatprep.mubr.msk.f32.mxu0 %vm9251_vm2, %v9246_v7  ;;  %v3417_v34 = vsel %vm2923_vm4, %v9479_v63, 0 }
 0x303   :  { %8430 = vmatprep.subr.mxu0 %v9246_v7  ;;  %v3487_v35 = vand.u32 4294901760, %v3417_v34 }
 0x305   :  { %v3488_v37 = vsub.f32 %v3417_v34, %v3487_v35 }
 0x307   :  { %v3489_v41 = vand.u32 4294901760, %v3488_v37 }
 0x309   :  { %8428 = vmatmul.mubr.f32.vlgmr.msra.gmra.mrb[0].mxu0 %v2054_v10  ;;  %v3490_v44 = vsub.f32 %v3488_v37, %v3489_v41 }
 0x30a   :  { %8431 = vmatpush3.msra.mxu0 %v2443_v48  ;;  %8432 = vmatprep.mubr.msk.f32.mxu0 %vm9251_vm2, %v9246_v7 }
 0x30b   :  { %8435 = vmatprep.subr.mxu0 %v9246_v7 }
 0x311   :  { %8433 = vmatmul.mubr.f32.vlgmr.msra.gmra.mrb[0].mxu0 %v2512_v55 }
 0x312   :  { %8436 = vmatpush3.msra.mxu0 %v2523_v56  ;;  %8437 = vmatprep.mubr.msk.f32.mxu0 %vm9251_vm2, %v9246_v7 }
 0x313   :  { %8440 = vmatprep.subr.mxu0 %v9246_v7 }
 0x319   :  { %8438 = vmatmul.mubr.f32.vlgmr.msra.gmra.mrb[0].mxu0 %v2508_v47 }
 0x31a   :  { %8441 = vmatpush3.msra.mxu0 %v2520_v50  ;;  %8442 = vmatprep.mubr.msk.f32.mxu0 %vm9251_vm2, %v9246_v7 }
 0x31b   :  { %8445 = vmatprep.subr.mxu0 %v9246_v7 }
 0x321   :  { %8443 = vmatmul.mubr.f32.vlgmr.msra.gmra.mrb[0].mxu0 %v2509_v49  ;;  %v3500_v49 = vsub.f32 %v3498_v43, %v3499_v46 }
 0x322   :  { %8446 = vmatpush3.msra.mxu0 %v2443_v48  ;;  %8447 = vmatprep.mubr.msk.f32.mxu0 %vm9251_vm2, %v9246_v7 }
 0x323   :  { %8450 = vmatprep.subr.mxu0 %v9246_v7  ;;  %v3501_v50 = vand.u32 4294901760, %v3500_v49 }
 0x329   :  { %8448 = vmatmul.mubr.f32.vlgmr.msra.gmra.mrb[0].mxu0 %v2510_v51 }
 0x32a   :  { %8451 = vmatpush3.msra.mxu0 %v2521_v52  ;;  %8452 = vmatprep.mubr.msk.f32.mxu0 %vm9251_vm2, %v9246_v7 }
 0x32b   :  { %8455 = vmatprep.subr.mxu0 %v9246_v7 }
 0x331   :  { %8453 = vmatmul.mubr.f32.vlgmr.msra.gmra.mrb[0].mxu0 %v2508_v47 }
 0x332   :  { %8456 = vmatpush3.msra.mxu0 %v2443_v48  ;;  %8457 = vmatprep.mubr.msk.f32.mxu0 %vm9251_vm2, %v9246_v7 }
 0x339   :  { %8458 = vmatmul.mubr.f32.vlgmr.msra.gmra.mrb[0].mxu0 %v2508_v47  ;;  %v3491_v47 = vand.u32 4294901760, %v3490_v44 }
 0x40c   :  { %v2884_v57 = vpop.f32.mrb[0].mxu0 }
 0x40d   :  { %2889 = vadd.xlane.f32.xlu1 %v2884_v57  ;;  %v8459_v58 = vpop.f32.mrb[1].mxu0 }
 0x41e   :  { %2901 = vperm.xlu1 %9202, %v9373_v27  }
 0x422   :  { %2915 = vrot.lane.b32.xlu1 %v9479_v63, %s9249_s28 }
 0x426   :  { %2917 = vrot.lane.b32.xlu1 %v9486_v0, %s9249_s28 }
 0x49a   :  { %v2890_v59 = vpop.xlane.xlu1 %2889 }
 0x49b   :  { %v2891_v60 = vmul.f32 0.0078125, %v2890_v59 }
 0x49d   :  { %v2892_v61 = vsub.f32 %v2884_v57, %v2891_v60 }
 0x49e   :  { %v2902_v1 = vpop.permute.xlu1 %2901 }
 0x49f   :  { %v2893_v62 = vmul.f32 %v2892_v61, %v2892_v61 }
 0x4a1   :  { %2894 = vadd.xlane.f32.xlu0 %v2893_v62 }
 0x4a2   :  { %v2916_v2 = vpop.permute.xlu1 %2915 }
 0x4a3   :  { %v2924_v3 = vsel %vm2923_vm4, %v2916_v2, 0 }
 0x4a4   :  { %v9493_v4 = vand.u32 4294901760, %v2924_v3 }
 0x4a6   :  { %v2995_v5 = vsub.f32 %v2924_v3, %v9493_v4  ;;  %v2918_v20 = vpop.permute.xlu1 %2917 }
 0x4a7   :  { %v2926_v21 = vsel %vm2923_vm4, %v2918_v20, 0 }
 0x4a8   :  { %v2996_v6 = vand.u32 4294901760, %v2995_v5  ;;  %v3004_v22 = vand.u32 4294901760, %v2926_v21 }
 0x4aa   :  { %v2997_v9 = vsub.f32 %v2995_v5, %v2996_v6  ;;  %v3005_v23 = vsub.f32 %v2926_v21, %v3004_v22 }
 0x4ac   :  { %v2998_v12 = vand.u32 4294901760, %v2997_v9  ;;  %v3006_v24 = vand.u32 4294901760, %v3005_v23 }
 0x4ae   :  { %8462 = vmatprep.mubr.f32.mxu1 %v2998_v12  ;;  %v3007_v25 = vsub.f32 %v3005_v23, %v3006_v24 }
 0x4b0   :  { %v3008_v30 = vand.u32 4294901760, %v3007_v25 }
 0x4b7   :  { %2906 = vperm.xlu0 %9203, %v9373_v27  }
 0x4bb   :  { %9204 = vset.pattern.permute.xlu0 %v9247_v26 }
 0x52e   :  { %v2895_v8 = vpop.xlane.xlu0 %2894 }
 0x52f   :  { %v2896_v11 = vmul.f32 0.0078125, %v2895_v8 }
 0x531   :  { %v2897_v27 = vadd.f32 1e-05, %v2896_v11 }
 0x533   :  { %9210 = vrsqrt.f32 %v2897_v27 }
 0x536   :  { %v2907_v15 = vpop.permute.xlu0 %2906 }
 0x53d   :  { %v9211_v13 = vpop.eup %9210 }
 0x53e   :  { %v2899_v14 = vmul.f32 %v9211_v13, %v2892_v61 }
 0x540   :  { %v2904_v16 = vmul.f32 %v2902_v1, %v2899_v14 }
 0x542   :  { %v2909_v18 = vadd.f32 %v2907_v15, %v2904_v16 }
 0x544   :  { %v2910_v19 = vmax.f32 %v2909_v18, 0.0 }
 0x546   :  { %2920 = vrot.lane.b32.xlu1 %v2910_v19, %s9253_s7  ;;  %v3422_v36 = vand.u32 4294901760, %v2910_v19 }
 0x548   :  { %v3509_v39 = vsub.f32 %v2910_v19, %v3422_v36 }
 0x54a   :  { %3910 = vrot.lane.b32.xlu1 %v9479_v63, %s9254_s8  ;;  %v3510_v42 = vand.u32 4294901760, %v3509_v39 }
 0x54c   :  { %v3511_v45 = vsub.f32 %v3509_v39, %v3510_v42 }
 0x54e   :  { %3912 = vrot.lane.b32.xlu1 %v9486_v0, %s9254_s8  ;;  %v3512_v48 = vand.u32 4294901760, %v3511_v45 }
 0x552   :  { %3914 = vrot.lane.b32.xlu1 %v2910_v19, %s9255_s9 }
 0x556   :  { %4412 = vrot.lane.b32.xlu1 %v9479_v63, %s9256_s10 }
 0x55a   :  { %4414 = vrot.lane.b32.xlu1 %v9486_v0, %s9256_s10 }
 0x55e   :  { %4416 = vrot.lane.b32.xlu1 %v2910_v19, %s9257_s11 }
 0x5b8   :  { %v2921_v28 = vpop.permute.xlu1 %2920 }
 0x5b9   :  { %v2929_v29 = vand.u32 4294901760, %v2921_v28 }
 0x5bb   :  { %v3016_v31 = vsub.f32 %v2921_v28, %v2929_v29  ;;  %8460 = vmatprep.subr.mxu1 %v2929_v29 }
 0x5bc   :  { %8461 = vmatpush3.msra.mxu1 %v2929_v29  ;;  %v3911_v51 = vpop.permute.xlu1 %3910 }
 0x5bd   :  { %8463 = vmatmul.mubr.f32.vlgmr.msra.gmra.mrb[4].mxu1 %v3008_v30  ;;  %v3017_v32 = vand.u32 4294901760, %v3016_v31  ;;  %v3917_v53 = vsel %vm2923_vm4, %v3911_v51, 0 }
 0x5be   :  { %8467 = vmatprep.mubr.f32.mxu1 %v9493_v4  ;;  %v3987_v54 = vand.u32 4294901760, %v3917_v53 }
 0x5bf   :  { %v3018_v33 = vsub.f32 %v3016_v31, %v3017_v32 }
 0x5c0   :  { %v3913_v52 = vpop.permute.xlu1 %3912  ;;  %v3988_v57 = vsub.f32 %v3917_v53, %v3987_v54 }
 0x5c1   :  { %v3019_v10 = vand.u32 4294901760, %v3018_v33  ;;  %v3919_v58 = vsel %vm2923_vm4, %v3913_v52, 0 }
 0x5c2   :  { %v3989_v60 = vand.u32 4294901760, %v3988_v57  ;;  %v3997_v61 = vand.u32 4294901760, %v3919_v58 }
 0x5c3   :  { %8465 = vmatprep.subr.mxu1 %v3019_v10 }
 0x5c4   :  { %8466 = vmatpush3.msra.mxu1 %v3019_v10  ;;  %v3915_v55 = vpop.permute.xlu1 %3914  ;;  %v3990_v1 = vsub.f32 %v3988_v57, %v3989_v60  ;;  %v3998_v2 = vsub.f32 %v3919_v58, %v3997_v61 }
 0x5c5   :  { %8468 = vmatmul.mubr.f32.vlgmr.msra.gmra.mrb[4].mxu1 %v3004_v22  ;;  %8470 = vmatprep.subr.mxu1 %v3016_v31  ;;  %v3922_v56 = vand.u32 4294901760, %v3915_v55 }
 0x5c6   :  { %8471 = vmatpush3.msra.mxu1 %v3016_v31  ;;  %8472 = vmatprep.mubr.f32.mxu1 %v2995_v5  ;;  %v3999_v5 = vand.u32 4294901760, %v3998_v2 }
 0x5c7   :  { %8475 = vmatprep.subr.mxu1 %v2929_v29  ;;  %v4009_v59 = vsub.f32 %v3915_v55, %v3922_v56 }
 0x5c8   :  { %v4000_v8 = vsub.f32 %v3998_v2, %v3999_v5  ;;  %v4413_v11 = vpop.permute.xlu1 %4412 }
 0x5c9   :  { %v4010_v62 = vand.u32 4294901760, %v4009_v59  ;;  %v4419_v27 = vsel %vm2923_vm4, %v4413_v11, 0 }
 0x5ca   :  { %v4001_v9 = vand.u32 4294901760, %v4000_v8  ;;  %v4489_v13 = vand.u32 4294901760, %v4419_v27 }
 0x5cb   :  { %v4011_v3 = vsub.f32 %v4009_v59, %v4010_v62 }
 0x5cc   :  { %v4415_v12 = vpop.permute.xlu1 %4414  ;;  %v4490_v16 = vsub.f32 %v4419_v27, %v4489_v13 }
 0x5cd   :  { %8473 = vmatmul.mubr.f32.vlgmr.msra.gmra.mrb[4].mxu1 %v3005_v23  ;;  %v4421_v18 = vsel %vm2923_vm4, %v4415_v12, 0 }
 0x5ce   :  { %8476 = vmatpush3.msra.mxu1 %v2929_v29  ;;  %8477 = vmatprep.mubr.f32.mxu1 %v2996_v6  ;;  %v4012_v6 = vand.u32 4294901760, %v4011_v3  ;;  %v4491_v20 = vand.u32 4294901760, %v4490_v16  ;;  %v4499_v21 = vand.u32 4294901760, %v4421_v18 }
 0x5cf   :  { %8480 = vmatprep.subr.mxu1 %v3017_v32 }
 0x5d0   :  { %v4417_v14 = vpop.permute.xlu1 %4416  ;;  %v4492_v23 = vsub.f32 %v4490_v16, %v4491_v20 }
 0x5d1   :  { %v4424_v15 = vand.u32 4294901760, %v4417_v14 }
 0x5d2   :  { %v4493_v28 = vand.u32 4294901760, %v4492_v23 }
 0x5d3   :  { %v4511_v19 = vsub.f32 %v4417_v14, %v4424_v15 }
 0x5d5   :  { %8478 = vmatmul.mubr.f32.vlgmr.msra.gmra.mrb[4].mxu1 %v3006_v24  ;;  %v4500_v24 = vsub.f32 %v4421_v18, %v4499_v21 }
 0x5d6   :  { %8481 = vmatpush3.msra.mxu1 %v3017_v32  ;;  %8482 = vmatprep.mubr.f32.mxu1 %v9493_v4 }
 0x5d7   :  { %8485 = vmatprep.subr.mxu1 %v2929_v29 }
 0x5dd   :  { %8483 = vmatmul.mubr.f32.vlgmr.msra.gmra.mrb[4].mxu1 %v3004_v22 }
 0x5de   :  { %8486 = vmatpush3.msra.mxu1 %v2929_v29  ;;  %8487 = vmatprep.mubr.f32.mxu1 %v9493_v4  ;;  %v3991_v4 = vand.u32 4294901760, %v3990_v1  ;;  %v4501_v29 = vand.u32 4294901760, %v4500_v24 }
 0x5df   :  { %8490 = vmatprep.subr.mxu1 %v3422_v36 }
 0x5e0   :  { %v4502_v31 = vsub.f32 %v4500_v24, %v4501_v29 }
 0x5e2   :  { %v4503_v32 = vand.u32 4294901760, %v4502_v31 }
 0x5e5   :  { %8488 = vmatmul.mubr.f32.vlgmr.msra.gmra.mrb[4].mxu1 %v3004_v22  ;;  %v4512_v22 = vand.u32 4294901760, %v4511_v19 }
 0x5e6   :  { %8491 = vmatpush3.msra.mxu1 %v3422_v36  ;;  %8492 = vmatprep.mubr.f32.mxu1 %v3491_v47 }
 0x5e7   :  { %8495 = vmatprep.subr.mxu1 %v3512_v48  ;;  %v4513_v25 = vsub.f32 %v4511_v19, %v4512_v22 }
 0x5e9   :  { %v4514_v30 = vand.u32 4294901760, %v4513_v25 }
 0x5ed   :  { %8493 = vmatmul.mubr.f32.vlgmr.msra.gmra.mrb[4].mxu1 %v3501_v50 }
 0x5ee   :  { %8496 = vmatpush3.msra.mxu1 %v3512_v48  ;;  %8497 = vmatprep.mubr.f32.mxu1 %v3487_v35 }
 0x5ef   :  { %8500 = vmatprep.subr.mxu1 %v3509_v39 }
 0x5f5   :  { %8498 = vmatmul.mubr.f32.vlgmr.msra.gmra.mrb[4].mxu1 %v3497_v40 }
 0x5f6   :  { %8501 = vmatpush3.msra.mxu1 %v3509_v39  ;;  %8502 = vmatprep.mubr.f32.mxu1 %v3488_v37 }
 0x5f7   :  { %8505 = vmatprep.subr.mxu1 %v3422_v36 }
 0x5fd   :  { %8503 = vmatmul.mubr.f32.vlgmr.msra.gmra.mrb[4].mxu1 %v3498_v43 }
 0x5fe   :  { %8506 = vmatpush3.msra.mxu1 %v3422_v36  ;;  %8507 = vmatprep.mubr.f32.mxu1 %v3489_v41 }
 0x5ff   :  { %8510 = vmatprep.subr.mxu1 %v3510_v42 }
 0x605   :  { %8508 = vmatmul.mubr.f32.vlgmr.msra.gmra.mrb[4].mxu1 %v3499_v46 }
 0x606   :  { %8511 = vmatpush3.msra.mxu1 %v3510_v42  ;;  %8512 = vmatprep.mubr.f32.mxu1 %v3487_v35 }
 0x607   :  { %8515 = vmatprep.subr.mxu1 %v3422_v36 }
 0x60d   :  { %8513 = vmatmul.mubr.f32.vlgmr.msra.gmra.mrb[4].mxu1 %v3497_v40 }
 0x60e   :  { %8516 = vmatpush3.msra.mxu1 %v3422_v36  ;;  %8517 = vmatprep.mubr.f32.mxu1 %v3487_v35 }
 0x60f   :  { %8520 = vmatprep.subr.mxu1 %v3922_v56 }
 0x615   :  { %8518 = vmatmul.mubr.f32.vlgmr.msra.gmra.mrb[4].mxu1 %v3497_v40 }
 0x616   :  { %8521 = vmatpush3.msra.mxu1 %v3922_v56  ;;  %8522 = vmatprep.mubr.f32.mxu1 %v3991_v4 }
 0x617   :  { %8525 = vmatprep.subr.mxu1 %v4012_v6 }
 0x61d   :  { %8523 = vmatmul.mubr.f32.vlgmr.msra.gmra.mrb[4].mxu1 %v4001_v9 }
 0x61e   :  { %8526 = vmatpush3.msra.mxu1 %v4012_v6  ;;  %8527 = vmatprep.mubr.f32.mxu1 %v3987_v54 }
 0x61f   :  { %8530 = vmatprep.subr.mxu1 %v4009_v59 }
 0x625   :  { %8528 = vmatmul.mubr.f32.vlgmr.msra.gmra.mrb[4].mxu1 %v3997_v61 }
 0x626   :  { %8531 = vmatpush3.msra.mxu1 %v4009_v59  ;;  %8532 = vmatprep.mubr.f32.mxu1 %v3988_v57 }
 0x627   :  { %8535 = vmatprep.subr.mxu1 %v3922_v56 }
 0x62d   :  { %8533 = vmatmul.mubr.f32.vlgmr.msra.gmra.mrb[4].mxu1 %v3998_v2 }
 0x62e   :  { %8536 = vmatpush3.msra.mxu1 %v3922_v56  ;;  %8537 = vmatprep.mubr.f32.mxu1 %v3989_v60 }
 0x62f   :  { %8540 = vmatprep.subr.mxu1 %v4010_v62 }
 0x635   :  { %8538 = vmatmul.mubr.f32.vlgmr.msra.gmra.mrb[4].mxu1 %v3999_v5 }
 0x636   :  { %8541 = vmatpush3.msra.mxu1 %v4010_v62  ;;  %8542 = vmatprep.mubr.f32.mxu1 %v3987_v54 }
 0x637   :  { %8545 = vmatprep.subr.mxu1 %v3922_v56 }
 0x63d   :  { %8543 = vmatmul.mubr.f32.vlgmr.msra.gmra.mrb[4].mxu1 %v3997_v61 }
 0x63e   :  { %8546 = vmatpush3.msra.mxu1 %v3922_v56  ;;  %8547 = vmatprep.mubr.f32.mxu1 %v3987_v54 }
 0x63f   :  { %8550 = vmatprep.subr.mxu1 %v4424_v15 }
 0x645   :  { %8548 = vmatmul.mubr.f32.vlgmr.msra.gmra.mrb[4].mxu1 %v3997_v61 }
 0x646   :  { %8551 = vmatpush3.msra.mxu1 %v4424_v15  ;;  %8552 = vmatprep.mubr.f32.mxu1 %v4493_v28 }
 0x647   :  { %8555 = vmatprep.subr.mxu1 %v4514_v30 }
 0x64d   :  { %8553 = vmatmul.mubr.f32.vlgmr.msra.gmra.mrb[4].mxu1 %v4503_v32 }
 0x64e   :  { %8556 = vmatpush3.msra.mxu1 %v4514_v30  ;;  %8557 = vmatprep.mubr.f32.mxu1 %v4489_v13 }
 0x64f   :  { %8560 = vmatprep.subr.mxu1 %v4511_v19 }
 0x655   :  { %8558 = vmatmul.mubr.f32.vlgmr.msra.gmra.mrb[4].mxu1 %v4499_v21 }
 0x656   :  { %8561 = vmatpush3.msra.mxu1 %v4511_v19  ;;  %8562 = vmatprep.mubr.f32.mxu1 %v4490_v16 }
 0x657   :  { %8565 = vmatprep.subr.mxu1 %v4424_v15 }
 0x65d   :  { %8563 = vmatmul.mubr.f32.vlgmr.msra.gmra.mrb[4].mxu1 %v4500_v24 }
 0x65e   :  { %8566 = vmatpush3.msra.mxu1 %v4424_v15  ;;  %8567 = vmatprep.mubr.f32.mxu1 %v4491_v20 }
 0x65f   :  { %8570 = vmatprep.subr.mxu1 %v4512_v22 }
 0x665   :  { %8568 = vmatmul.mubr.f32.vlgmr.msra.gmra.mrb[4].mxu1 %v4501_v29 }
 0x666   :  { %8571 = vmatpush3.msra.mxu1 %v4512_v22  ;;  %8572 = vmatprep.mubr.f32.mxu1 %v4489_v13 }
 0x667   :  { %8575 = vmatprep.subr.mxu1 %v4424_v15 }
 0x66d   :  { %8573 = vmatmul.mubr.f32.vlgmr.msra.gmra.mrb[4].mxu1 %v4499_v21 }
 0x66e   :  { %8576 = vmatpush3.msra.mxu1 %v4424_v15  ;;  %8577 = vmatprep.mubr.f32.mxu1 %v4489_v13 }
 0x675   :  { %8578 = vmatmul.mubr.f32.vlgmr.msra.gmra.mrb[4].mxu1 %v4499_v21 }
 0x676   :  { %8752 = vmatprep.mubr.msk.f32.mxu1 %vm9251_vm2, %v9246_v7 }
 0x748   :  { %v8579_v33 = vpop.f32.mrb[4].mxu1 }
 0x749   :  { %v4902_v10 = vpop.f32.mrb[5].mxu1  ;;  %v4918_v34 = vsel %vm4914_vm5, %v8579_v33, 0.0 }
 0x74a   :  { %4919 = vadd.xlane.f32.xlu1 %v4918_v34  ;;  %v4915_v35 = vsel %vm4914_vm5, %v4902_v10, 0.0 }
 0x74b   :  { %4916 = vadd.xlane.f32.xlu0 %v4915_v35 }
 0x75b   :  { %4942 = vperm.xlu1 %9202, %v9479_v63  }
 0x75f   :  { %9205 = vset.pattern.permute.xlu1 %v9248_v17 }
 0x760   :  { %4952 = vperm.xlu1 %9205, %v9479_v63   ;;  %v9539_v63 = vld [vmem:[%s9693_s1 + $0x28] sm:$0xff] }
 0x764   :  { %4956 = vperm.xlu1 %9205, %v9486_v0  }
 0x768   :  { %9206 = vset.pattern.permute.xlu1 %v9247_v26  ;;  %v9532_v26 = vld [vmem:[%s9693_s1 + $0x20] sm:$0xff] }
 0x769   :  { %4967 = vrot.lane.b32.xlu1 %v9532_v26, %s9254_s8 }
 0x76d   :  { %4969 = vrot.lane.b32.xlu1 %v9539_v63, %s9254_s8 }
 0x7d7   :  { %v4920_v36 = vpop.xlane.xlu1 %4919 }
 0x7d8   :  { %v4922_v37 = vmul.f32 0.03125, %v4920_v36  ;;  %v4917_v38 = vpop.xlane.xlu0 %4916 }
 0x7d9   :  { %v4921_v39 = vmul.f32 0.03125, %v4917_v38 }
 0x7da   :  { %v4924_v40 = vsub.f32 %v8579_v33, %v4922_v37 }
 0x7db   :  { %v4923_v41 = vsub.f32 %v4902_v10, %v4921_v39  ;;  %v4943_v46 = vpop.permute.xlu1 %4942 }
 0x7dc   :  { %v4926_v42 = vmul.f32 %v4924_v40, %v4924_v40 }
 0x7dd   :  { %v4925_v44 = vmul.f32 %v4923_v41, %v4923_v41 }
 0x7de   :  { %v4930_v43 = vsel %vm4914_vm5, %v4926_v42, 0.0 }
 0x7df   :  { %4931 = vadd.xlane.f32.xlu0 %v4930_v43  ;;  %v4927_v45 = vsel %vm4914_vm5, %v4925_v44, 0.0  ;;  %v4953_v47 = vpop.permute.xlu1 %4952 }
 0x7e3   :  { %4928 = vadd.xlane.f32.xlu0 %v4927_v45  ;;  %v4957_v48 = vpop.permute.xlu1 %4956 }
 0x7e7   :  { %v4968_v51 = vpop.permute.xlu1 %4967 }
 0x7e8   :  { %v4980_v53 = vsel %vm4979_vm6, %v4968_v51, 0 }
 0x7e9   :  { %v9544_v55 = vand.u32 4294901760, %v4980_v53 }
 0x7eb   :  { %v9547_v57 = vsub.f32 %v4980_v53, %v9544_v55  ;;  %v4970_v28 = vpop.permute.xlu1 %4969 }
 0x7ec   :  { %v4982_v29 = vsel %vm4979_vm6, %v4970_v28, 0 }
 0x7ed   :  { %v5053_v58 = vand.u32 4294901760, %v9547_v57  ;;  %v5061_v30 = vand.u32 4294901760, %v4982_v29 }
 0x7ef   :  { %v5054_v59 = vsub.f32 %v9547_v57, %v5053_v58  ;;  %v5062_v31 = vsub.f32 %v4982_v29, %v5061_v30 }
 0x7f1   :  { %v5055_v60 = vand.u32 4294901760, %v5054_v59  ;;  %v5063_v10 = vand.u32 4294901760, %v5062_v31 }
 0x7f3   :  { %8584 = vmatprep.mubr.f32.mxu0 %v5055_v60  ;;  %v5064_v38 = vsub.f32 %v5062_v31, %v5063_v10 }
 0x7f5   :  { %v5065_v43 = vand.u32 4294901760, %v5064_v38 }
 0x7f9   :  { %4946 = vperm.xlu0 %9204, %v9486_v0  }
 0x86c   :  { %v4932_v0 = vpop.xlane.xlu0 %4931 }
 0x86d   :  { %v4934_v49 = vmul.f32 0.03125, %v4932_v0 }
 0x86f   :  { %v4936_v50 = vadd.f32 1e-05, %v4934_v49  ;;  %v5486_v49 = vsel %vm4979_vm6, %v9532_v26, 0 }
 0x870   :  { %v4929_v52 = vpop.xlane.xlu0 %4928 }
 0x871   :  { %9212 = vrsqrt.f32 %v4936_v50  ;;  %v4933_v54 = vmul.f32 0.03125, %v4929_v52  ;;  %v5557_v50 = vand.u32 4294901760, %v5486_v49  ;;  %v5488_v52 = vsel %vm4979_vm6, %v9539_v63, 0 }
 0x872   :  { %v5567_v53 = vand.u32 4294901760, %v5488_v52 }
 0x873   :  { %v4935_v56 = vadd.f32 1e-05, %v4933_v54  ;;  %v5558_v51 = vsub.f32 %v5486_v49, %v5557_v50 }
 0x875   :  { %9214 = vrsqrt.f32 %v4935_v56  ;;  %v5559_v54 = vand.u32 4294901760, %v5558_v51  ;;  %v5568_v56 = vsub.f32 %v5488_v52, %v5567_v53 }
 0x878   :  { %v4947_v62 = vpop.permute.xlu0 %4946 }
 0x87b   :  { %v9213_v61 = vpop.eup %9212 }
 0x87c   :  { %v4940_v1 = vmul.f32 %v9213_v61, %v4924_v40 }
 0x87e   :  { %v4950_v2 = vmul.f32 %v4947_v62, %v4940_v1 }
 0x87f   :  { %v9215_v3 = vpop.eup %9214 }
 0x880   :  { %v4939_v4 = vmul.f32 %v9215_v3, %v4923_v41  ;;  %v4960_v5 = vadd.f32 %v4957_v48, %v4950_v2 }
 0x882   :  { %v4949_v6 = vmul.f32 %v4943_v46, %v4939_v4  ;;  %v4962_v8 = vmax.f32 %v4960_v5, 0.0 }
 0x884   :  { %v4959_v9 = vadd.f32 %v4953_v47, %v4949_v6  ;;  %v5494_v11 = vand.u32 4294901760, %v4962_v8 }
 0x886   :  { %v4961_v12 = vmax.f32 %v4959_v9, 0.0  ;;  %v5586_v27 = vsub.f32 %v4962_v8, %v5494_v11 }
 0x888   :  { %v5491_v13 = vand.u32 4294901760, %v4961_v12  ;;  %5996 = vrot.lane.b32.xlu0 %v4961_v12, %s9254_s8  ;;  %4973 = vrot.lane.b32.xlu1 %v4961_v12, %s9249_s28  ;;  %v5587_v14 = vand.u32 4294901760, %v5586_v27 }
 0x88a   :  { %v9555_v15 = vpack.c.bf16 %v5494_v11, %v5491_v13  ;;  %v5579_v16 = vsub.f32 %v4961_v12, %v5491_v13  ;;  %v5588_v19 = vsub.f32 %v5586_v27, %v5587_v14 }
 0x88c   :  { %6510 = vrot.lane.b32.xlu0 %v9532_v26, %s9258_s16  ;;  %4975 = vrot.lane.b32.xlu1 %v4962_v8, %s9249_s28  ;;  %v5580_v18 = vand.u32 4294901760, %v5579_v16  ;;  %v9559_v20 = vpack.c.bf16 %v5586_v27, %v5579_v16  ;;  %v5589_v24 = vand.u32 4294901760, %v5588_v19 }
 0x88e   :  { %v5581_v21 = vsub.f32 %v5579_v16, %v5580_v18  ;;  %v9561_v22 = vpack.c.bf16 %v5587_v14, %v5580_v18 }
 0x890   :  { %6514 = vrot.lane.b32.xlu0 %v4961_v12, %s9256_s10  ;;  %5992 = vrot.lane.b32.xlu1 %v9532_v26, %s9253_s7  ;;  %v5582_v23 = vand.u32 4294901760, %v5581_v21 }
 0x892   :  { %v9566_v25 = vpack.c.bf16 %v5589_v24, %v5582_v23 }
 0x894   :  { %5994 = vrot.lane.b32.xlu1 %v9539_v63, %s9253_s7  ;;  %s9222_s7 = scalar_lea.vmem %s8084_s4, 1024 }
 0x895   :  { %p9223_p0 = scmp.ne.s32.totalorder %s8084_s4, %s9222_s7  ;;  %p9228_p2 = scmp.lt.s32.totalorder %s9222_s7, %s9222_s7 }
 0x897   :  { %p9229_p3 = por %p9228_p2, %p9227_p1 }
 0x898   :  { %5998 = vrot.lane.b32.xlu1 %v4962_v8, %s9254_s8 }
 0x899   :  { %p9230_p4 = pnand %p9229_p3, %p9223_p0 }
 0x89c   :  { %6512 = vrot.lane.b32.xlu1 %v9539_v63, %s9258_s16 }
 0x8a0   :  { %6516 = vrot.lane.b32.xlu1 %v4962_v8, %s9256_s10 }
 0x8fa   :  { %v4974_v32 = vpop.permute.xlu1 %4973  ;;  %v5997_v2 = vpop.permute.xlu0 %5996 }
 0x8fb   :  { %v4985_v33 = vand.u32 4294901760, %v4974_v32  ;;  %v6007_v5 = vand.u32 4294901760, %v5997_v2 }
 0x8fd   :  { %v5073_v34 = vsub.f32 %v4974_v32, %v4985_v33  ;;  %v6095_v9 = vsub.f32 %v5997_v2, %v6007_v5 }
 0x8fe   :  { %v4976_v35 = vpop.permute.xlu1 %4975 }
 0x8ff   :  { %v5074_v36 = vand.u32 4294901760, %v5073_v34  ;;  %v4988_v37 = vand.u32 4294901760, %v4976_v35  ;;  %v6096_v13 = vand.u32 4294901760, %v6095_v9 }
 0x901   :  { %v8868_v39 = vpack.c.bf16 %v4988_v37, %v4985_v33  ;;  %v5080_v40 = vsub.f32 %v4976_v35, %v4988_v37  ;;  %v5075_v41 = vsub.f32 %v5073_v34, %v5074_v36  ;;  %v6511_v33 = vpop.permute.xlu0 %6510 }
 0x902   :  { %v6520_v35 = vsel %vm4979_vm6, %v6511_v33, 0 }
 0x903   :  { %v5081_v42 = vand.u32 4294901760, %v5080_v40  ;;  %8869 = vmatprep.subr.bf16.mxu0 %v8868_v39  ;;  %v5076_v45 = vand.u32 4294901760, %v5075_v41  ;;  %v8876_v48 = vpack.c.bf16 %v5080_v40, %v5073_v34  ;;  %v6591_v38 = vand.u32 4294901760, %v6520_v35 }
 0x904   :  { %8871 = vmatpush3.bf16.msra.mxu0 %v8868_v39 }
 0x905   :  { %v5082_v44 = vsub.f32 %v5080_v40, %v5081_v42  ;;  %v8884_v0 = vpack.c.bf16 %v5081_v42, %v5074_v36  ;;  %v6515_v36 = vpop.permute.xlu0 %6514  ;;  %v6592_v41 = vsub.f32 %v6520_v35, %v6591_v38 }
 0x907   :  { %8585 = vmatmul.mubr.f32.vlgmr.msra.gmra.mrb[2].mxu0 %v5065_v43  ;;  %v5083_v46 = vand.u32 4294901760, %v5082_v44 }
 0x908   :  { %8591 = vmatprep.mubr.f32.mxu0 %v9544_v55 }
 0x909   :  { %v8872_v47 = vpack.c.bf16 %v5083_v46, %v5076_v45  ;;  %v6593_v45 = vand.u32 4294901760, %v6592_v41 }
 0x90b   :  { %8873 = vmatprep.subr.bf16.mxu0 %v8872_v47  ;;  %v6594_v49 = vsub.f32 %v6592_v41, %v6593_v45 }
 0x90c   :  { %8875 = vmatpush3.bf16.msra.mxu0 %v8872_v47 }
 0x90d   :  { %8877 = vmatprep.subr.bf16.mxu0 %v8876_v48 }
 0x90f   :  { %8592 = vmatmul.mubr.f32.vlgmr.msra.gmra.mrb[2].mxu0 %v5061_v30 }
 0x910   :  { %8879 = vmatpush3.bf16.msra.mxu0 %v8876_v48  ;;  %8598 = vmatprep.mubr.f32.mxu0 %v9547_v57  ;;  %v5560_v57 = vsub.f32 %v5558_v51, %v5559_v54 }
 0x911   :  { %8881 = vmatprep.subr.bf16.mxu0 %v8868_v39 }
 0x912   :  { %v5561_v59 = vand.u32 4294901760, %v5560_v57 }
 0x917   :  { %8599 = vmatmul.mubr.f32.vlgmr.msra.gmra.mrb[2].mxu0 %v5062_v31 }
 0x918   :  { %8883 = vmatpush3.bf16.msra.mxu0 %v8868_v39  ;;  %8605 = vmatprep.mubr.f32.mxu0 %v5053_v58  ;;  %v5569_v58 = vand.u32 4294901760, %v5568_v56 }
 0x919   :  { %8885 = vmatprep.subr.bf16.mxu0 %v8884_v0 }
 0x91a   :  { %v5570_v60 = vsub.f32 %v5568_v56, %v5569_v58 }
 0x91c   :  { %v5571_v61 = vand.u32 4294901760, %v5570_v60 }
 0x91f   :  { %8606 = vmatmul.mubr.f32.vlgmr.msra.gmra.mrb[2].mxu0 %v5063_v10 }
 0x920   :  { %8887 = vmatpush3.bf16.msra.mxu0 %v8884_v0  ;;  %8612 = vmatprep.mubr.f32.mxu0 %v9544_v55 }
 0x921   :  { %8889 = vmatprep.subr.bf16.mxu0 %v8868_v39 }
 0x927   :  { %8613 = vmatmul.mubr.f32.vlgmr.msra.gmra.mrb[2].mxu0 %v5061_v30 }
 0x928   :  { %8891 = vmatpush3.bf16.msra.mxu0 %v8868_v39  ;;  %8619 = vmatprep.mubr.f32.mxu0 %v9544_v55  ;;  %v5993_v55 = vpop.permute.xlu1 %5992  ;;  %v6525_v39 = vand.u32 4294901760, %v6515_v36 }
 0x929   :  { %8893 = vmatprep.subr.bf16.mxu0 %v9555_v15  ;;  %v6002_v3 = vsel %vm4979_vm6, %v5993_v55, 0 }
 0x92a   :  { %v9594_v6 = vand.u32 4294901760, %v6002_v3  ;;  %v6613_v42 = vsub.f32 %v6515_v36, %v6525_v39 }
 0x92c   :  { %v5995_v62 = vpop.permute.xlu1 %5994  ;;  %v6074_v11 = vsub.f32 %v6002_v3, %v9594_v6  ;;  %v6614_v46 = vand.u32 4294901760, %v6613_v42 }
 0x92d   :  { %v6004_v12 = vsel %vm4979_vm6, %v5995_v62, 0 }
 0x92e   :  { %v9600_v14 = vand.u32 4294901760, %v6004_v12  ;;  %v6075_v16 = vand.u32 4294901760, %v6074_v11 }
 0x92f   :  { %8620 = vmatmul.mubr.f32.vlgmr.msra.gmra.mrb[2].mxu0 %v5061_v30 }
 0x930   :  { %8895 = vmatpush3.bf16.msra.mxu0 %v9555_v15  ;;  %8626 = vmatprep.mubr.f32.mxu0 %v5561_v59  ;;  %v5999_v1 = vpop.permute.xlu1 %5998  ;;  %v6084_v21 = vsub.f32 %v6004_v12, %v9600_v14 }
 0x931   :  { %8897 = vmatprep.subr.bf16.mxu0 %v9566_v25  ;;  %v6010_v4 = vand.u32 4294901760, %v5999_v1 }
 0x932   :  { %v6085_v24 = vand.u32 4294901760, %v6084_v21 }
 0x933   :  { %v6102_v8 = vsub.f32 %v5999_v1, %v6010_v4  ;;  %v8916_v18 = vpack.c.bf16 %v6010_v4, %v6007_v5 }
 0x934   :  { %v6086_v30 = vsub.f32 %v6084_v21, %v6085_v24 }
 0x935   :  { %v6103_v27 = vand.u32 4294901760, %v6102_v8  ;;  %v8924_v32 = vpack.c.bf16 %v6102_v8, %v6095_v9 }
 0x936   :  { %v6087_v31 = vand.u32 4294901760, %v6086_v30 }
 0x937   :  { %8627 = vmatmul.mubr.f32.vlgmr.msra.gmra.mrb[2].mxu0 %v5571_v61  ;;  %v6104_v19 = vsub.f32 %v6102_v8, %v6103_v27  ;;  %v8932_v10 = vpack.c.bf16 %v6103_v27, %v6096_v13 }
 0x938   :  { %8899 = vmatpush3.bf16.msra.mxu0 %v9566_v25  ;;  %8633 = vmatprep.mubr.f32.mxu0 %v5557_v50 }
 0x939   :  { %8901 = vmatprep.subr.bf16.mxu0 %v9559_v20  ;;  %v6105_v23 = vand.u32 4294901760, %v6104_v19 }
 0x93f   :  { %8634 = vmatmul.mubr.f32.vlgmr.msra.gmra.mrb[2].mxu0 %v5567_v53 }
 0x940   :  { %8903 = vmatpush3.bf16.msra.mxu0 %v9559_v20  ;;  %8640 = vmatprep.mubr.f32.mxu0 %v5558_v51  ;;  %v6097_v20 = vsub.f32 %v6095_v9, %v6096_v13 }
 0x941   :  { %8905 = vmatprep.subr.bf16.mxu0 %v9555_v15 }
 0x942   :  { %v6098_v25 = vand.u32 4294901760, %v6097_v20 }
 0x944   :  { %v8920_v29 = vpack.c.bf16 %v6105_v23, %v6098_v25 }
 0x947   :  { %8641 = vmatmul.mubr.f32.vlgmr.msra.gmra.mrb[2].mxu0 %v5568_v56 }
 0x948   :  { %8907 = vmatpush3.bf16.msra.mxu0 %v9555_v15  ;;  %8647 = vmatprep.mubr.f32.mxu0 %v5559_v54 }
 0x949   :  { %8909 = vmatprep.subr.bf16.mxu0 %v9561_v22 }
 0x94f   :  { %8648 = vmatmul.mubr.f32.vlgmr.msra.gmra.mrb[2].mxu0 %v5569_v58 }
 0x950   :  { %8911 = vmatpush3.bf16.msra.mxu0 %v9561_v22  ;;  %8654 = vmatprep.mubr.f32.mxu0 %v5557_v50  ;;  %v6076_v22 = vsub.f32 %v6074_v11, %v6075_v16 }
 0x951   :  { %8913 = vmatprep.subr.bf16.mxu0 %v9555_v15 }
 0x952   :  { %v6077_v28 = vand.u32 4294901760, %v6076_v22  ;;  %v9624_v22 = vld [vmem:[%s9693_s1 + $0x30] sm:$0xf] }
 0x957   :  { %8655 = vmatmul.mubr.f32.vlgmr.msra.gmra.mrb[2].mxu0 %v5567_v53 }
 0x958   :  { %8915 = vmatpush3.bf16.msra.mxu0 %v9555_v15  ;;  %8661 = vmatprep.mubr.f32.mxu0 %v5557_v50  ;;  %v6513_v15 = vpop.permute.xlu1 %6512  ;;  %v6615_v50 = vsub.f32 %v6613_v42, %v6614_v46 }
 0x959   :  { %8917 = vmatprep.subr.bf16.mxu0 %v8916_v18  ;;  %v6522_v43 = vsel %vm4979_vm6, %v6513_v15, 0 }
 0x95a   :  { %v6601_v47 = vand.u32 4294901760, %v6522_v43  ;;  %v6616_v56 = vand.u32 4294901760, %v6615_v50 }
 0x95c   :  { %v6517_v34 = vpop.permute.xlu1 %6516  ;;  %v6602_v51 = vsub.f32 %v6522_v43, %v6601_v47 }
 0x95d   :  { %v6528_v37 = vand.u32 4294901760, %v6517_v34 }
 0x95e   :  { %v6603_v54 = vand.u32 4294901760, %v6602_v51 }
 0x95f   :  { %8662 = vmatmul.mubr.f32.vlgmr.msra.gmra.mrb[2].mxu0 %v5567_v53  ;;  %v6620_v40 = vsub.f32 %v6517_v34, %v6528_v37  ;;  %v8940_v48 = vpack.c.bf16 %v6528_v37, %v6525_v39  ;;  %v6595_v53 = vand.u32 4294901760, %v6594_v49 }
 0x960   :  { %8919 = vmatpush3.bf16.msra.mxu0 %v8916_v18  ;;  %8668 = vmatprep.mubr.f32.mxu0 %v6077_v28  ;;  %v6604_v58 = vsub.f32 %v6602_v51, %v6603_v54 }
 0x961   :  { %8921 = vmatprep.subr.bf16.mxu0 %v8920_v29  ;;  %v6621_v44 = vand.u32 4294901760, %v6620_v40  ;;  %v8948_v60 = vpack.c.bf16 %v6620_v40, %v6613_v42 }
 0x962   :  { %v6605_v59 = vand.u32 4294901760, %v6604_v58  ;;  %v7564_v58 = vld [vmem:[%s9693_s1 + $0x38] sm:$0x1]  ;;  %s9260_s1 = smov 126  }
 0x963   :  { %v6622_v0 = vsub.f32 %v6620_v40, %v6621_v44  ;;  %v8956_v61 = vpack.c.bf16 %v6621_v44, %v6614_v46 }
 0x965   :  { %v6623_v52 = vand.u32 4294901760, %v6622_v0 }
 0x967   :  { %8669 = vmatmul.mubr.f32.vlgmr.msra.gmra.mrb[2].mxu0 %v6087_v31  ;;  %v8944_v57 = vpack.c.bf16 %v6623_v52, %v6616_v56 }
 0x968   :  { %8923 = vmatpush3.bf16.msra.mxu0 %v8920_v29  ;;  %8675 = vmatprep.mubr.f32.mxu0 %v9594_v6 }
 0x969   :  { %8925 = vmatprep.subr.bf16.mxu0 %v8924_v32 }
 0x96f   :  { %8676 = vmatmul.mubr.f32.vlgmr.msra.gmra.mrb[2].mxu0 %v9600_v14 }
 0x970   :  { %8927 = vmatpush3.bf16.msra.mxu0 %v8924_v32  ;;  %8682 = vmatprep.mubr.f32.mxu0 %v6074_v11 }
 0x971   :  { %8929 = vmatprep.subr.bf16.mxu0 %v8916_v18 }
 0x977   :  { %8683 = vmatmul.mubr.f32.vlgmr.msra.gmra.mrb[2].mxu0 %v6084_v21 }
 0x978   :  { %8931 = vmatpush3.bf16.msra.mxu0 %v8916_v18  ;;  %8689 = vmatprep.mubr.f32.mxu0 %v6075_v16 }
 0x979   :  { %8933 = vmatprep.subr.bf16.mxu0 %v8932_v10 }
 0x97f   :  { %8690 = vmatmul.mubr.f32.vlgmr.msra.gmra.mrb[2].mxu0 %v6085_v24 }
 0x980   :  { %8935 = vmatpush3.bf16.msra.mxu0 %v8932_v10  ;;  %8696 = vmatprep.mubr.f32.mxu0 %v9594_v6 }
 0x981   :  { %8937 = vmatprep.subr.bf16.mxu0 %v8916_v18 }
 0x987   :  { %8697 = vmatmul.mubr.f32.vlgmr.msra.gmra.mrb[2].mxu0 %v9600_v14 }
 0x988   :  { %8939 = vmatpush3.bf16.msra.mxu0 %v8916_v18  ;;  %8703 = vmatprep.mubr.f32.mxu0 %v9594_v6 }
 0x989   :  { %8941 = vmatprep.subr.bf16.mxu0 %v8940_v48 }
 0x98f   :  { %8704 = vmatmul.mubr.f32.vlgmr.msra.gmra.mrb[2].mxu0 %v9600_v14 }
 0x990   :  { %8943 = vmatpush3.bf16.msra.mxu0 %v8940_v48  ;;  %8710 = vmatprep.mubr.f32.mxu0 %v6595_v53 }
 0x991   :  { %8945 = vmatprep.subr.bf16.mxu0 %v8944_v57 }
 0x997   :  { %8711 = vmatmul.mubr.f32.vlgmr.msra.gmra.mrb[2].mxu0 %v6605_v59 }
 0x998   :  { %8947 = vmatpush3.bf16.msra.mxu0 %v8944_v57  ;;  %8717 = vmatprep.mubr.f32.mxu0 %v6591_v38 }
 0x999   :  { %8949 = vmatprep.subr.bf16.mxu0 %v8948_v60 }
 0x99f   :  { %8718 = vmatmul.mubr.f32.vlgmr.msra.gmra.mrb[2].mxu0 %v6601_v47 }
 0x9a0   :  { %8951 = vmatpush3.bf16.msra.mxu0 %v8948_v60  ;;  %8724 = vmatprep.mubr.f32.mxu0 %v6592_v41 }
 0x9a1   :  { %8953 = vmatprep.subr.bf16.mxu0 %v8940_v48 }
 0x9a7   :  { %8725 = vmatmul.mubr.f32.vlgmr.msra.gmra.mrb[2].mxu0 %v6602_v51 }
 0x9a8   :  { %8955 = vmatpush3.bf16.msra.mxu0 %v8940_v48  ;;  %8731 = vmatprep.mubr.f32.mxu0 %v6593_v45 }
 0x9a9   :  { %8957 = vmatprep.subr.bf16.mxu0 %v8956_v61 }
 0x9af   :  { %8732 = vmatmul.mubr.f32.vlgmr.msra.gmra.mrb[2].mxu0 %v6603_v54 }
 0x9b0   :  { %8959 = vmatpush3.bf16.msra.mxu0 %v8956_v61  ;;  %8738 = vmatprep.mubr.f32.mxu0 %v6591_v38 }
 0x9b1   :  { %8961 = vmatprep.subr.bf16.mxu0 %v8940_v48 }
 0x9b7   :  { %8739 = vmatmul.mubr.f32.vlgmr.msra.gmra.mrb[2].mxu0 %v6601_v47 }
 0x9b8   :  { %8963 = vmatpush3.bf16.msra.mxu0 %v8940_v48  ;;  %8745 = vmatprep.mubr.f32.mxu0 %v6591_v38 }
 0x9bf   :  { %8746 = vmatmul.mubr.f32.vlgmr.msra.gmra.mrb[2].mxu0 %v6601_v47 }
 0xa92   :  { %v8747_v55 = vpop.f32.mrb[2].mxu0 }
 0xa93   :  { %v7016_v62 = vpop.f32.mrb[3].mxu0  ;;  %v7031_v1 = vsel %vm2923_vm4, %v8747_v55, 0.0 }
 0xa94   :  { %7032 = vadd.xlane.f32.xlu1 %v7031_v1  ;;  %v7028_v2 = vsel %vm2923_vm4, %v7016_v62, 0.0 }
 0xa95   :  { %7029 = vadd.xlane.f32.xlu0 %v7028_v2 }
 0xaa5   :  { %7055 = vperm.xlu1 %9206, %v9532_v26  }
 0xaa9   :  { %9207 = vset.pattern.permute.xlu1 %v9248_v17  ;;  %v9259_v17 = vmov 0.0|0.0  }
 0xaaa   :  { %7065 = vperm.xlu1 %9207, %v9532_v26   ;;  %8964 = vmatprep.subr.bf16.mxu1 %v9259_v17 }
 0xaae   :  { %7069 = vperm.xlu1 %9207, %v9539_v63  }
 0xb21   :  { %v7033_v3 = vpop.xlane.xlu1 %7032 }
 0xb22   :  { %v7035_v4 = vmul.f32 0.125, %v7033_v3  ;;  %v7030_v5 = vpop.xlane.xlu0 %7029 }
 0xb23   :  { %v7034_v6 = vmul.f32 0.125, %v7030_v5 }
 0xb24   :  { %v7037_v8 = vsub.f32 %v8747_v55, %v7035_v4  ;;  %v7570_v4 = vsel %vm1078_vm3, %v7564_v58, 0 }
 0xb25   :  { %v7036_v9 = vsub.f32 %v7016_v62, %v7034_v6  ;;  %v7056_v20 = vpop.permute.xlu1 %7055  ;;  %v7641_v5 = vand.u32 4294901760, %v7570_v4 }
 0xb26   :  { %v7039_v11 = vmul.f32 %v7037_v8, %v7037_v8 }
 0xb27   :  { %v7038_v27 = vmul.f32 %v7036_v9, %v7036_v9  ;;  %v7642_v6 = vsub.f32 %v7570_v4, %v7641_v5 }
 0xb28   :  { %v7043_v12 = vsel %vm2923_vm4, %v7039_v11, 0.0 }
 0xb29   :  { %7044 = vadd.xlane.f32.xlu0 %v7043_v12  ;;  %v7040_v13 = vsel %vm2923_vm4, %v7038_v27, 0.0  ;;  %v7066_v23 = vpop.permute.xlu1 %7065 }
 0xb2d   :  { %7041 = vadd.xlane.f32.xlu0 %v7040_v13  ;;  %v7070_v30 = vpop.permute.xlu1 %7069 }
 0xb43   :  { %7059 = vperm.xlu0 %9204, %v9539_v63   ;;  %v7078_v63 = vsel %vm4979_vm6, %v9624_v22, 0 }
 0xb44   :  { %v7147_v25 = vand.u32 4294901760, %v7078_v63 }
 0xb46   :  { %v7148_v15 = vsub.f32 %v7078_v63, %v7147_v25 }
 0xb48   :  { %v7149_v36 = vand.u32 4294901760, %v7148_v15 }
 0xb4a   :  { %v7150_v41 = vsub.f32 %v7148_v15, %v7149_v36 }
 0xb4c   :  { %v7151_v46 = vand.u32 4294901760, %v7150_v41 }
 0xbb6   :  { %v7045_v26 = vpop.xlane.xlu0 %7044 }
 0xbb7   :  { %v7047_v14 = vmul.f32 0.125, %v7045_v26 }
 0xbb9   :  { %v7049_v16 = vadd.f32 1e-05, %v7047_v14 }
 0xbba   :  { %v7042_v18 = vpop.xlane.xlu0 %7041 }
 0xbbb   :  { %9216 = vrsqrt.f32 %v7049_v16  ;;  %v7046_v19 = vmul.f32 0.125, %v7042_v18 }
 0xbbd   :  { %v7048_v21 = vadd.f32 1e-05, %v7046_v19 }
 0xbbf   :  { %9218 = vrsqrt.f32 %v7048_v21 }
 0xbc2   :  { %v7060_v29 = vpop.permute.xlu0 %7059 }
 0xbc5   :  { %v9217_v24 = vpop.eup %9216 }
 0xbc6   :  { %v7053_v28 = vmul.f32 %v9217_v24, %v7037_v8 }
 0xbc8   :  { %v7063_v31 = vmul.f32 %v7060_v29, %v7053_v28 }
 0xbc9   :  { %v9219_v32 = vpop.eup %9218 }
 0xbca   :  { %v7052_v33 = vmul.f32 %v9219_v32, %v7036_v9  ;;  %v7073_v10 = vadd.f32 %v7070_v30, %v7063_v31  ;;  %v7643_v9 = vand.u32 4294901760, %v7642_v6 }
 0xbcc   :  { %v7062_v34 = vmul.f32 %v7056_v20, %v7052_v33  ;;  %v7075_v35 = vmax.f32 %v7073_v10, 0.0  ;;  %v7644_v26 = vsub.f32 %v7642_v6, %v7643_v9 }
 0xbce   :  { %v7072_v37 = vadd.f32 %v7066_v23, %v7062_v34  ;;  %v7084_v38 = vand.u32 4294901760, %v7075_v35  ;;  %v7645_v18 = vand.u32 4294901760, %v7644_v26 }
 0xbd0   :  { %v7074_v39 = vmax.f32 %v7072_v37, 0.0  ;;  %v7166_v40 = vsub.f32 %v7075_v35, %v7084_v38 }
 0xbd2   :  { %v7081_v42 = vand.u32 4294901760, %v7074_v39  ;;  %v7167_v43 = vand.u32 4294901760, %v7166_v40 }
 0xbd4   :  { %v7159_v44 = vsub.f32 %v7074_v39, %v7081_v42  ;;  %v8965_v45 = vpack.c.bf16 %v7084_v38, %v7081_v42  ;;  %v7168_v48 = vsub.f32 %v7166_v40, %v7167_v43 }
 0xbd6   :  { %v7160_v47 = vand.u32 4294901760, %v7159_v44  ;;  %8966 = vmatpush3.bf16.msra.mxu1 %v8965_v45  ;;  %v7169_v50 = vand.u32 4294901760, %v7168_v48  ;;  %v8971_v52 = vpack.c.bf16 %v7166_v40, %v7159_v44 }
 0xbd7   :  { %8967 = vmatprep.subr.bf16.mxu1 %v9259_v17 }
 0xbd8   :  { %v7161_v0 = vsub.f32 %v7159_v44, %v7160_v47  ;;  %v8977_v53 = vpack.c.bf16 %v7167_v43, %v7160_v47 }
 0xbd9   :  { %8753 = vmatmul.mubr.f32.vlgmr.msra.gmra.mrb[6].mxu1 %v7151_v46 }
 0xbda   :  { %v7162_v49 = vand.u32 4294901760, %v7161_v0  ;;  %8759 = vmatprep.mubr.msk.f32.mxu1 %vm9251_vm2, %v9246_v7 }
 0xbdc   :  { %v8968_v51 = vpack.c.bf16 %v7169_v50, %v7162_v49 }
 0xbde   :  { %8969 = vmatpush3.bf16.msra.mxu1 %v8968_v51 }
 0xbdf   :  { %8970 = vmatprep.subr.bf16.mxu1 %v9259_v17 }
 0xbe1   :  { %8760 = vmatmul.mubr.f32.vlgmr.msra.gmra.mrb[6].mxu1 %v7147_v25 }
 0xbe2   :  { %8972 = vmatpush3.bf16.msra.mxu1 %v8971_v52  ;;  %8766 = vmatprep.mubr.msk.f32.mxu1 %vm9251_vm2, %v9246_v7 }
 0xbe3   :  { %8973 = vmatprep.subr.bf16.mxu1 %v9259_v17 }
 0xbe9   :  { %8767 = vmatmul.mubr.f32.vlgmr.msra.gmra.mrb[6].mxu1 %v7148_v15 }
 0xbea   :  { %8975 = vmatpush3.bf16.msra.mxu1 %v8965_v45  ;;  %8773 = vmatprep.mubr.msk.f32.mxu1 %vm9251_vm2, %v9246_v7 }
 0xbeb   :  { %8976 = vmatprep.subr.bf16.mxu1 %v9259_v17 }
 0xbf1   :  { %8774 = vmatmul.mubr.f32.vlgmr.msra.gmra.mrb[6].mxu1 %v7149_v36 }
 0xbf2   :  { %8978 = vmatpush3.bf16.msra.mxu1 %v8977_v53  ;;  %8780 = vmatprep.mubr.msk.f32.mxu1 %vm9251_vm2, %v9246_v7 }
 0xbf3   :  { %8979 = vmatprep.subr.bf16.mxu1 %v9259_v17 }
 0xbf9   :  { %8781 = vmatmul.mubr.f32.vlgmr.msra.gmra.mrb[6].mxu1 %v7147_v25 }
 0xbfa   :  { %8981 = vmatpush3.bf16.msra.mxu1 %v8965_v45  ;;  %8787 = vmatprep.mubr.msk.f32.mxu1 %vm9251_vm2, %v9246_v7 }
 0xbfb   :  { %8790 = vmatprep.subr.mxu1 %v9246_v7 }
 0xc01   :  { %8788 = vmatmul.mubr.f32.vlgmr.msra.gmra.mrb[6].mxu1 %v7147_v25 }
 0xc02   :  { %8792 = vmatprep.mubr.msk.f32.mxu1 %vm9251_vm2, %v9246_v7 }
 0xcd4   :  { %v7535_v54 = vpop.f32.mrb[6].mxu1 }
 0xcd5   :  { %v8789_v56 = vpop.f32.mrb[7].mxu1  ;;  %v7540_v57 = vsel %vm7539_vm7, %v7535_v54, 0.0 }
 0xcd6   :  { %7541 = vadd.xlane.f32.xlu0 %v7540_v57 }
 0xcec   :  { %7554 = vperm.xlu0 %9204, %v9624_v22  }
 0xcf0   :  { %7567 = vperm.xlu0 %9204, %v7564_v58  }
 0xd63   :  { %v7542_v59 = vpop.xlane.xlu0 %7541 }
 0xd64   :  { %v7543_v60 = vmul.f32 0.125, %v7542_v59 }
 0xd66   :  { %v7544_v61 = vsub.f32 %v7535_v54, %v7543_v60 }
 0xd68   :  { %v7545_v55 = vmul.f32 %v7544_v61, %v7544_v61 }
 0xd6a   :  { %v7546_v62 = vsel %vm7539_vm7, %v7545_v55, 0.0 }
 0xd6b   :  { %7547 = vadd.xlane.f32.xlu1 %v7546_v62  ;;  %v7555_v12 = vpop.permute.xlu0 %7554 }
 0xd6f   :  { %v7568_v63 = vpop.permute.xlu0 %7567 }
 0xd7c   :  { %7559 = vperm.xlu1 %9207, %v9624_v22  }
 0xdf8   :  { %v7548_v1 = vpop.xlane.xlu1 %7547 }
 0xdf9   :  { %v7549_v2 = vmul.f32 0.125, %v7548_v1 }
 0xdfb   :  { %v7550_v3 = vadd.f32 1e-05, %v7549_v2 }
 0xdfc   :  { %v7560_v13 = vpop.permute.xlu1 %7559 }
 0xdfd   :  { %9220 = vrsqrt.f32 %v7550_v3 }
 0xe07   :  { %v9221_v8 = vpop.eup %9220 }
 0xe08   :  { %v7552_v11 = vmul.f32 %v9221_v8, %v7544_v61 }
 0xe0a   :  { %v7557_v27 = vmul.f32 %v7555_v12, %v7552_v11 }
 0xe0c   :  { %v7562_v17 = vadd.f32 %v7560_v13, %v7557_v27 }
 0xe0e   :  { %v7563_v14 = vmax.f32 %v7562_v17, 0.0 }
 0xe10   :  { %v7573_v16 = vsel %vm25_vm0, %v7563_v14, 0 }
 0xe11   :  { %v7576_v19 = vand.u32 4294901760, %v7573_v16 }
 0xe13   :  { %v7653_v20 = vsub.f32 %v7573_v16, %v7576_v19  ;;  %8791 = vmatpush3.msra.mxu1 %v7576_v19 }
 0xe14   :  { %8793 = vmatmul.mubr.f32.vlgmr.msra.gmra.mrb[8].mxu1 %v7645_v18  ;;  %8795 = vmatprep.subr.mxu1 %v9246_v7 }
 0xe15   :  { %v7654_v21 = vand.u32 4294901760, %v7653_v20  ;;  %8797 = vmatprep.mubr.msk.f32.mxu1 %vm9251_vm2, %v9246_v7 }
 0xe17   :  { %v7655_v22 = vsub.f32 %v7653_v20, %v7654_v21 }
 0xe19   :  { %v7656_v23 = vand.u32 4294901760, %v7655_v22 }
 0xe1b   :  { %8796 = vmatpush3.msra.mxu1 %v7656_v23 }
 0xe1c   :  { %8798 = vmatmul.mubr.f32.vlgmr.msra.gmra.mrb[8].mxu1 %v7641_v5  ;;  %8800 = vmatprep.subr.mxu1 %v9246_v7 }
 0xe1d   :  { %8801 = vmatpush3.msra.mxu1 %v7653_v20  ;;  %8802 = vmatprep.mubr.msk.f32.mxu1 %vm9251_vm2, %v9246_v7 }
 0xe1e   :  { %8805 = vmatprep.subr.mxu1 %v9246_v7 }
 0xe24   :  { %8803 = vmatmul.mubr.f32.vlgmr.msra.gmra.mrb[8].mxu1 %v7642_v6 }
 0xe25   :  { %8806 = vmatpush3.msra.mxu1 %v7576_v19  ;;  %8807 = vmatprep.mubr.msk.f32.mxu1 %vm9251_vm2, %v9246_v7 }
 0xe26   :  { %8810 = vmatprep.subr.mxu1 %v9246_v7 }
 0xe2c   :  { %8808 = vmatmul.mubr.f32.vlgmr.msra.gmra.mrb[8].mxu1 %v7643_v9 }
 0xe2d   :  { %8811 = vmatpush3.msra.mxu1 %v7654_v21  ;;  %8812 = vmatprep.mubr.msk.f32.mxu1 %vm9251_vm2, %v9246_v7 }
 0xe2e   :  { %8815 = vmatprep.subr.mxu1 %v9246_v7 }
 0xe34   :  { %8813 = vmatmul.mubr.f32.vlgmr.msra.gmra.mrb[8].mxu1 %v7641_v5 }
 0xe35   :  { %8816 = vmatpush3.msra.mxu1 %v7576_v19  ;;  %8817 = vmatprep.mubr.msk.f32.mxu1 %vm9251_vm2, %v9246_v7 }
 0xe3c   :  { %8818 = vmatmul.mubr.f32.vlgmr.msra.gmra.mrb[8].mxu1 %v7641_v5 }
 0xf0f   :  { %v8017_v24 = vpop.f32.mrb[8].mxu1 }
 0xf10   :  { %v8982_v25 = vadd.f32 %v8017_v24, %v7568_v63  ;;  %v8819_v28 = vpop.f32.mrb[9].mxu1 }
 0xf12   :  { %8035 = vrot.lane.b32.xlu0 %v8982_v25, %s9250_s29  ;;  %8027 = vrot.lane.b32.xlu1 %v8982_v25, %s9260_s1  ;;  %9161 = vpush %v8982_v25 }
 0xf16   :  { %8049 = vrot.lane.b32.xlu0 %v8982_v25, %s9261_s21  ;;  %8042 = vrot.lane.b32.xlu1 %v8982_v25, %s9262_s22 }
 0xf1a   :  { %8064 = vrot.lane.b32.xlu0 %v8982_v25, %s9263_s23  ;;  %8057 = vrot.lane.b32.xlu1 %v8982_v25, %s9264_s24 }
 0xf1e   :  { %8071 = vrot.lane.b32.xlu1 %v8982_v25, %s9265_s25 }
 0xf43   :  { %s9162_s26 = spop %9161 }
 0xf44   :  { %v8023_v7 = vstv %s9162_s26 }
 0xf45   :  { %8025 = vst.msk [vmem:[#allocation2] sm:$0xff] %vm4979_vm6, %v8023_v7  ;;  %8026 = vst.msk [vmem:[#allocation2 + $0x8] sm:$0xff] %vm4979_vm6, %v8023_v7 }
 0xf84   :  { %v8036_v29 = vpop.permute.xlu0 %8035  ;;  %v8028_v30 = vpop.permute.xlu1 %8027 }
 0xf85   :  { %9163 = vpush %v8028_v30 }
 0xf86   :  { %9165 = vpush %v8036_v29 }
 0xf88   :  { %v8050_v31 = vpop.permute.xlu0 %8049  ;;  %v8043_v32 = vpop.permute.xlu1 %8042 }
 0xf89   :  { %9167 = vpush %v8043_v32 }
 0xf8a   :  { %9169 = vpush %v8050_v31 }
 0xf8c   :  { %v8065_v15 = vpop.permute.xlu0 %8064  ;;  %v8058_v33 = vpop.permute.xlu1 %8057 }
 0xf8d   :  { %9171 = vpush %v8058_v33 }
 0xf8e   :  { %9173 = vpush %v8065_v15 }
 0xf90   :  { %v8072_v10 = vpop.permute.xlu1 %8071 }
 0xf91   :  { %9175 = vpush %v8072_v10 }
 0xfb6   :  { %s9164_s0 = spop %9163 }
 0xfb7   :  { %v8030_v34 = vstv %s9164_s0  ;;  %s9166_s27 = spop %9165 }
 0xfb8   :  { %8033 = vst.msk [vmem:[#allocation2] sm:$0xff] %vm8032_vm8, %v8030_v34  ;;  %8034 = vst.msk [vmem:[#allocation2 + $0x8] sm:$0xff] %vm8032_vm8, %v8030_v34  ;;  %v8038_v35 = vstv %s9166_s27 }
 0xfb9   :  { %8040 = vst.msk [vmem:[#allocation2 + $0x10] sm:$0xff] %vm4979_vm6, %v8038_v35  ;;  %8041 = vst.msk [vmem:[#allocation2 + $0x18] sm:$0xff] %vm4979_vm6, %v8038_v35 }
 0xfba   :  { %s9168_s28 = spop %9167 }
 0xfbb   :  { %v8045_v36 = vstv %s9168_s28  ;;  %s9170_s29 = spop %9169 }
 0xfbc   :  { %8047 = vst.msk [vmem:[#allocation2 + $0x10] sm:$0xff] %vm8032_vm8, %v8045_v36  ;;  %8048 = vst.msk [vmem:[#allocation2 + $0x18] sm:$0xff] %vm8032_vm8, %v8045_v36  ;;  %v8052_v37 = vstv %s9170_s29 }
 0xfbd   :  { %8055 = vst.msk [vmem:[#allocation2 + $0x20] sm:$0xff] %vm4979_vm6, %v8052_v37  ;;  %8056 = vst.msk [vmem:[#allocation2 + $0x28] sm:$0xff] %vm4979_vm6, %v8052_v37 }
 0xfbe   :  { %s9172_s30 = spop %9171 }
 0xfbf   :  { %v8060_v38 = vstv %s9172_s30  ;;  %s9174_s5 = spop %9173 }
 0xfc0   :  { %8062 = vst.msk [vmem:[#allocation2 + $0x20] sm:$0xff] %vm8032_vm8, %v8060_v38  ;;  %8063 = vst.msk [vmem:[#allocation2 + $0x28] sm:$0xff] %vm8032_vm8, %v8060_v38  ;;  %v8067_v39 = vstv %s9174_s5 }
 0xfc1   :  { %8069 = vst.msk [vmem:[#allocation2 + $0x30] sm:$0xff] %vm4979_vm6, %v8067_v39  ;;  %8070 = vst.msk [vmem:[#allocation2 + $0x38] sm:$0xff] %vm4979_vm6, %v8067_v39 }
 0xfc2   :  { %s9176_s6 = spop %9175 }
 0xfc3   :  { %v8074_v40 = vstv %s9176_s6 }
 0xfc4   :  { %8076 = vst.msk [vmem:[#allocation2 + $0x30] sm:$0xff] %vm8032_vm8, %v8074_v40  ;;  %8077 = vst.msk [vmem:[#allocation2 + $0x38] sm:$0xff] %vm8032_vm8, %v8074_v40 }
 0xfc5   :  { %9233 = shalt.err (!%p9230_p4)
}
 0xfc6   :  { %s9234_s10 = scalar_lea.hbm %s9694_s2, 1024 }
 0xfc7   :  { %p9235_p5 = scmp.ne.s32.totalorder %s9694_s2, %s9234_s10  ;;  %p9238_p6 = scmp.lt.u32.totalorder %s9234_s10, %s9694_s2 }
 0xfc9   :  { %p9240_p7 = pnand %p9238_p6, %p9235_p5 }
 0xfcb   :  { %9243 = shalt.err (!%p9240_p7)
}
 0xfcc   :  { %s9267_s15 = smov 128   ;;  %s9268_s16 = smov 8  }
 0xfcd   :  { %8089 = dma.vmem_to_hbm [thread:$0]  %s8084_s4, 1024, %s9694_s2, [#allocation3], %s9267_s15, %s9267_s15, %s9268_s16  }
 0xfce   :  { %9244 = dma.done.wait [#allocation3], 1024  }
 0xfcf   :  { %9245 = vsyncadd [#allocation3], 4294966272 }
 0xfd0   :  { %8093 = vsyncpa [#allocation3], 1 }

</bundles_post_ra>
